<compile_context>
chip_gen: v7x
topology: tpu7x:2x2x1
jax: 0.10.0
libtpu: 0.0.40
codegen_flags: <defaults>
</compile_context>

<pallas_src>
import math

import jax
import jax.numpy as jnp
from jax import lax
from jax.experimental import pallas as pl
from jax.experimental.pallas import tpu as pltpu


def _device_tuning():
    """(K-chunk, per-block byte budget, prefer-even-grid) for the local TPU."""
    kc, budget, want_even = 256, 8 << 20, False
    try:
        kind = jax.devices()[0].device_kind.lower()
    except Exception:
        kind = ""
    if "v5" in kind:
        kc = 128                               # 4x128x128 MXU
    if "v7" in kind or "7x" in kind:
        budget, want_even = 4 << 20, True      # 64 MiB VMEM, 2 TensorCores
    return kc, budget, want_even


def _select_rows(B, H, W, H_out, W_out, itemsize, budget, want_even):
    """Rows of the flattened (B*H, W) input per grid block.

    Legal candidates (blocks satisfy the (8,128)/full rule and map to a
    contiguous, exactly-sized output row block):
      * sub-plane tiles: tr | H, tr % 8 == 0, tr*H_out % H == 0, tr_out % 8 == 0
      * whole-plane groups: tr = bt*H with bt | B, tr % 8 == 0, bt*H_out % 8 == 0
      * the full array (always legal).
    """
    total = B * H
    cands = {total}
    for tr in range(8, H + 1, 8):
        if H % tr or (tr * H_out) % H:
            continue
        tro = (tr * H_out) // H
        if tro and tro % 8 == 0:
            cands.add(tr)
    for bt in range(1, B + 1):
        if B % bt:
            continue
        if (bt * H) % 8 == 0 and (bt * H_out) % 8 == 0:
            cands.add(bt * H)

    def nbytes(tr):
        return (tr * W + (tr * H_out // H) * W_out) * itemsize

    fitting = [t for t in cands if nbytes(t) <= budget]
    if not fitting:
        tr = min(cands, key=nbytes)
    else:
        def score(t):
            steps = total // t
            if not want_even:
                return (1, t)
            if steps >= 2 and steps % 2 == 0:
                return (2, t)          # v7x: both TensorCores, balanced split
            if steps >= 2:
                return (1, t)
            return (0, t)
        tr = max(fitting, key=score)
    return tr, tr * H_out // H


def _col_bands(W, W_out, kc):
    """Contiguous input-column chunks and their (disjoint, exhaustive) output
    column bands: band of chunk [k0,k1) is [ceil(k0*Wo/W), ceil(k1*Wo/W))."""
    bands = []
    k0 = 0
    while k0 < W:
        k1 = min(W, k0 + kc)
        j0 = -((-k0 * W_out) // W)
        j1 = -((-k1 * W_out) // W)
        bands.append((k0, k1, j0, j1))
        k0 = k1
    return bands


def _build_rw_tiles(W, W_out, bands, dtype):
    """One-hot column-repeat tiles, one per band (a single shared tile when the
    width ratio is an integer).  Built once and kept VMEM-resident via a
    constant index_map."""
    if W_out % W == 0:                         # integer ratio: bands share a tile
        r = W_out // W
        dk = max(k1 - k0 for k0, k1, _, _ in bands)
        tile = (jnp.arange(dk * r, dtype=jnp.int32)[None, :] // r
                == jnp.arange(dk, dtype=jnp.int32)[:, None])
        return tile.astype(dtype)[None], True
    dk_max = max(k1 - k0 for k0, k1, _, _ in bands)
    dj_max = max(j1 - j0 for _, _, j0, j1 in bands)
    tiles = []
    for (k0, k1, j0, j1) in bands:
        src = (jnp.arange(j0, j1, dtype=jnp.int32) * W) // W_out
        t = (src[None, :] == jnp.arange(k0, k1, dtype=jnp.int32)[:, None])
        t = jnp.pad(t.astype(dtype),
                    ((0, dk_max - (k1 - k0)), (0, dj_max - (j1 - j0))))
        tiles.append(t)
    return jnp.stack(tiles), False


def _row_ranges(tr, H, H_out):
    """Local input row m in [0, tr) -> contiguous local output row range."""
    def rng(h):
        return (-((-h * H_out) // H), -((-(h + 1) * H_out) // H))
    ranges = []
    for m in range(tr):
        if tr <= H:
            lo, hi = rng(m)
        else:
            p, h = divmod(m, H)
            lo, hi = rng(h)
            lo, hi = lo + p * H_out, hi + p * H_out
        ranges.append((lo, hi))
    return ranges


def _row_chunks(tr, dk_max, bw_max, in_bytes, acc_bytes, target=128 << 10):
    """Chunk block rows so each matmul's live LHS + result stays small."""
    per_row = bw_max * acc_bytes + dk_max * in_bytes
    mh = max(8, (target // max(1, per_row)) // 8 * 8)
    mh = min(mh, tr)
    return [(m0, min(tr, m0 + mh)) for m0 in range(0, tr, mh)]


def _make_kernel(row_chunks, row_ranges, col_bands, shared_rw,
                 acc_dtype, out_dtype, precision):
    def kernel(x_ref, rw_ref, o_ref):
        for (m0, m1) in row_chunks:
            for bi, (k0, k1, j0, j1) in enumerate(col_bands):
                dk, dj = k1 - k0, j1 - j0
                if dk == 0 or dj == 0:
                    continue
                # Width upsample: small lane-dense MXU matmul against this
                # band's one-hot tile -- only dk of the W input columns feed
                # these dj output columns.
                rwb = rw_ref[0 if shared_rw else bi, :dk, :dj]
                y = jnp.dot(x_ref[m0:m1, k0:k1], rwb,
                            preferred_element_type=acc_dtype,
                            precision=precision).astype(out_dtype)
                # Height upsample: pure sublane row replication into static
                # contiguous output row slices, interleaved with the matmuls
                # so the live result stays bounded.
                for i in range(m1 - m0):
                    lo, hi = row_ranges[m0 + i]
                    if hi > lo:
                        o_ref[lo:hi, j0:j1] = jnp.broadcast_to(
                            y[i:i + 1, :], (hi - lo, dj))
    return kernel


def upsampler_forward(x, size=None, scale_factor=None, mode="nearest",
                      align_corners=False, kc_override=None):
    """Pallas implementation of Upsampler.forward (mode='nearest', NCHW)."""
    assert mode == "nearest", "only mode='nearest' implemented"
    # TODO(synk): 'bilinear'/'bicubic' (+ align_corners) would need dense
    # interpolation-weight matrices instead of one-hot tiles; not implemented.
    N, C, H, W = x.shape
    if size is not None:
        if isinstance(size, int):
            H_out, W_out = size, size
        else:
            H_out, W_out = (int(s) for s in size)
    else:
        sf = scale_factor
        sf_h, sf_w = (sf if isinstance(sf, (tuple, list)) else (sf, sf))
        H_out = int(math.floor(H * float(sf_h)))
        W_out = int(math.floor(W * float(sf_w)))
    assert H_out >= 1 and W_out >= 1
    dtype = x.dtype
    # TODO(synk): integer dtypes would need a gather path, not an MXU matmul.
    assert jnp.issubdtype(dtype, jnp.floating), "only floating dtypes supported"

    B = N * C
    itemsize = jnp.dtype(dtype).itemsize
    kc, budget, want_even = _device_tuning()
    if kc_override is not None:
        kc = int(kc_override)

    tr, tr_out = _select_rows(B, H, W, H_out, W_out, itemsize, budget, want_even)
    bands = _col_bands(W, W_out, kc)
    rw_tiles, shared = _build_rw_tiles(W, W_out, bands, dtype)
    row_ranges = _row_ranges(tr, H, H_out)

    if jnp.dtype(dtype) == jnp.dtype(jnp.bfloat16):
        acc_dtype = jnp.bfloat16        # exact: one nonzero weight per column
    else:
        acc_dtype = jnp.float32
    acc_bytes = jnp.dtype(acc_dtype).itemsize
    dk_max = max(k1 - k0 for k0, k1, _, _ in bands)
    bw_max = max(j1 - j0 for _, _, j0, j1 in bands)
    row_chunks = _row_chunks(tr, dk_max, bw_max, itemsize, acc_bytes)

    n_blocks = (B * H) // tr
    x2 = x.reshape(B * H, W)

    in_b = tr * W * itemsize
    out_b = tr_out * W_out * itemsize
    rw_b = int(rw_tiles.size) * itemsize
    need = 2 * (in_b + out_b + rw_b) + (4 << 20)   # double-buffered blocks + temps
    vmem_limit = int(min(max(32 << 20, need), 56 << 20))

    flops = 2 * (B * H) * sum((k1 - k0) * (j1 - j0) for k0, k1, j0, j1 in bands)
    bytes_accessed = (B * H * W + B * H_out * W_out) * itemsize + rw_b

    out2 = pl.pallas_call(
        _make_kernel(row_chunks, row_ranges, bands, shared,
                     acc_dtype, dtype, lax.Precision.HIGHEST),
        out_shape=jax.ShapeDtypeStruct((B * H_out, W_out), dtype),
        grid_spec=pltpu.PrefetchScalarGridSpec(
            num_scalar_prefetch=0,
            grid=(n_blocks,),
            in_specs=[
                pl.BlockSpec((tr, W), lambda i: (i, 0)),
                # Constant block index -> one-hot tiles are DMA'd once and stay
                # VMEM-resident across the whole grid (no per-step regeneration).
                pl.BlockSpec(rw_tiles.shape, lambda i: (0, 0, 0)),
            ],
            out_specs=pl.BlockSpec((tr_out, W_out), lambda i: (i, 0)),
        ),
        compiler_params=pltpu.CompilerParams(
            dimension_semantics=("parallel",),
            vmem_limit_bytes=vmem_limit),
        cost_estimate=pl.CostEstimate(
            flops=flops, transcendentals=0, bytes_accessed=bytes_accessed),
    )(x2, rw_tiles)

    return out2.reshape(N, C, H_out, W_out)


def _reference_nearest(x, H_out, W_out):
    """Pure-JAX reference matching PyTorch nearest-neighbor interpolation."""
    N, C, H, W = x.shape
    idx_h = (jnp.arange(H_out, dtype=jnp.int32) * H) // H_out
    idx_w = (jnp.arange(W_out, dtype=jnp.int32) * W) // W_out
    return x[:, :, idx_h, :][:, :, :, idx_w]


if __name__ == "__main__":
    key = jax.random.PRNGKey(0)
    N, C, H, W = 2, 4, 16, 16
    x = jax.random.normal(key, (N, C, H, W), dtype=jnp.float32)

    # Integer scale_factor path (the common GrImNet usage).
    out = jax.block_until_ready(
        upsampler_forward(x, scale_factor=2, mode="nearest"))
    ref = _reference_nearest(x, 2 * H, 2 * W)
    assert out.shape == (N, C, 2 * H, 2 * W), out.shape
    assert jnp.array_equal(out, ref), "mismatch (scale_factor=2)"

    # Explicit-size path with a non-integer ratio (uneven row/col repeats).
    out2 = jax.block_until_ready(
        upsampler_forward(x, size=(24, 40), mode="nearest"))
    ref2 = _reference_nearest(x, 24, 40)
    assert out2.shape == (N, C, 24, 40), out2.shape
    assert jnp.array_equal(out2, ref2), "mismatch (size=(24,40))"

    # Force multiple column bands at this small W to exercise the banded-matmul
    # path (the same code path large-W inputs take with kc = 128/256).
    out3 = jax.block_until_ready(
        upsampler_forward(x, scale_factor=2, mode="nearest", kc_override=8))
    assert jnp.array_equal(out3, ref), "mismatch (banded, scale_factor=2)"
    out4 = jax.block_until_ready(
        upsampler_forward(x, size=(24, 40), mode="nearest", kc_override=8))
    assert jnp.array_equal(out4, ref2), "mismatch (banded, size=(24,40))"

    print("KERNEL_OK")
</pallas_src>

<mosaic_0001>
module attributes {stable_mosaic.version = 11 : i64} {
  func.func @kernel(%arg0: i32, %arg1: memref<128x16xf32, #tpu.memory_space<vmem>>, %arg2: memref<1x16x32xf32, #tpu.memory_space<vmem>>, %arg3: memref<256x32xf32, #tpu.memory_space<vmem>>) attributes {dimension_semantics = [#tpu.dimension_semantics<parallel>], iteration_bounds = array<i64: 1>, scalar_prefetch = 0 : i64, scratch_operands = 0 : i64, tpu.core_type = #tpu.core_type<tc>, window_params = [{transform_indices = @transform_0, window_bounds = array<i64: 128, 16>}, {pipeline_mode = #tpu.pipeline_mode<synchronous>, transform_indices = @transform_1, window_bounds = array<i64: 1, 16, 32>}, {transform_indices = @transform_2, window_bounds = array<i64: 256, 32>}]} {
    %c0 = arith.constant 0 : index
    %c0_0 = arith.constant 0 : index
    %c0_1 = arith.constant 0 : index
    %0 = vector.load %arg2[%c0, %c0_0, %c0_1] : memref<1x16x32xf32, #tpu.memory_space<vmem>>, vector<1x16x32xf32>
    %1 = vector.shape_cast %0 : vector<1x16x32xf32> to vector<16x32xf32>
    %c0_2 = arith.constant 0 : index
    %c0_3 = arith.constant 0 : index
    %2 = vector.load %arg1[%c0_2, %c0_3] : memref<128x16xf32, #tpu.memory_space<vmem>>, vector<128x16xf32>
    %cst = arith.constant dense<0.000000e+00> : vector<128x32xf32>
    %3 = tpu.matmul %2, %1, %cst {dimension_numbers = #tpu.dot_dimension_numbers<[1], [0], [0], [1], [0, 0, 1, 1], [], []>, precision = #tpu.contract_precision<fp32>} : vector<128x16xf32>, vector<16x32xf32>, vector<128x32xf32> -> vector<128x32xf32>
    %4 = vector.extract_strided_slice %3 {offsets = [0, 0], sizes = [1, 32], strides = [1, 1]} : vector<128x32xf32> to vector<1x32xf32>
    %5 = vector.shape_cast %4 : vector<1x32xf32> to vector<1x32xf32>
    %6 = vector.broadcast %5 : vector<1x32xf32> to vector<2x32xf32>
    %c0_4 = arith.constant 0 : index
    %c0_5 = arith.constant 0 : index
    %7 = vector.load %arg3[%c0_4, %c0_5] : memref<256x32xf32, #tpu.memory_space<vmem>>, vector<2x32xf32>
    tpu.vector_store %arg3[%c0_4, %c0_5], %6 {strides = array<i32>} : memref<256x32xf32, #tpu.memory_space<vmem>>, vector<2x32xf32>,
    %8 = vector.extract_strided_slice %3 {offsets = [1, 0], sizes = [1, 32], strides = [1, 1]} : vector<128x32xf32> to vector<1x32xf32>
    %9 = vector.shape_cast %8 : vector<1x32xf32> to vector<1x32xf32>
    %10 = vector.broadcast %9 : vector<1x32xf32> to vector<2x32xf32>
    %c2 = arith.constant 2 : index
    %c0_6 = arith.constant 0 : index
    %11 = vector.load %arg3[%c2, %c0_6] : memref<256x32xf32, #tpu.memory_space<vmem>>, vector<2x32xf32>
    tpu.vector_store %arg3[%c2, %c0_6], %10 {strides = array<i32>} : memref<256x32xf32, #tpu.memory_space<vmem>>, vector<2x32xf32>,
    %12 = vector.extract_strided_slice %3 {offsets = [2, 0], sizes = [1, 32], strides = [1, 1]} : vector<128x32xf32> to vector<1x32xf32>
    %13 = vector.shape_cast %12 : vector<1x32xf32> to vector<1x32xf32>
    %14 = vector.broadcast %13 : vector<1x32xf32> to vector<2x32xf32>
    %c4 = arith.constant 4 : index
    %c0_7 = arith.constant 0 : index
    %15 = vector.load %arg3[%c4, %c0_7] : memref<256x32xf32, #tpu.memory_space<vmem>>, vector<2x32xf32>
    tpu.vector_store %arg3[%c4, %c0_7], %14 {strides = array<i32>} : memref<256x32xf32, #tpu.memory_space<vmem>>, vector<2x32xf32>,
    %16 = vector.extract_strided_slice %3 {offsets = [3, 0], sizes = [1, 32], strides = [1, 1]} : vector<128x32xf32> to vector<1x32xf32>
    %17 = vector.shape_cast %16 : vector<1x32xf32> to vector<1x32xf32>
    %18 = vector.broadcast %17 : vector<1x32xf32> to vector<2x32xf32>
    %c6 = arith.constant 6 : index
    %c0_8 = arith.constant 0 : index
    %19 = vector.load %arg3[%c6, %c0_8] : memref<256x32xf32, #tpu.memory_space<vmem>>, vector<2x32xf32>
    tpu.vector_store %arg3[%c6, %c0_8], %18 {strides = array<i32>} : memref<256x32xf32, #tpu.memory_space<vmem>>, vector<2x32xf32>,
    %20 = vector.extract_strided_slice %3 {offsets = [4, 0], sizes = [1, 32], strides = [1, 1]} : vector<128x32xf32> to vector<1x32xf32>
    %21 = vector.shape_cast %20 : vector<1x32xf32> to vector<1x32xf32>
    %22 = vector.broadcast %21 : vector<1x32xf32> to vector<2x32xf32>
    %c8 = arith.constant 8 : index
    %c0_9 = arith.constant 0 : index
    %23 = vector.load %arg3[%c8, %c0_9] : memref<256x32xf32, #tpu.memory_space<vmem>>, vector<2x32xf32>
    tpu.vector_store %arg3[%c8, %c0_9], %22 {strides = array<i32>} : memref<256x32xf32, #tpu.memory_space<vmem>>, vector<2x32xf32>,
    %24 = vector.extract_strided_slice %3 {offsets = [5, 0], sizes = [1, 32], strides = [1, 1]} : vector<128x32xf32> to vector<1x32xf32>
    %25 = vector.shape_cast %24 : vector<1x32xf32> to vector<1x32xf32>
    %26 = vector.broadcast %25 : vector<1x32xf32> to vector<2x32xf32>
    %c10 = arith.constant 10 : index
    %c0_10 = arith.constant 0 : index
    %27 = vector.load %arg3[%c10, %c0_10] : memref<256x32xf32, #tpu.memory_space<vmem>>, vector<2x32xf32>
    tpu.vector_store %arg3[%c10, %c0_10], %26 {strides = array<i32>} : memref<256x32xf32, #tpu.memory_space<vmem>>, vector<2x32xf32>,
    %28 = vector.extract_strided_slice %3 {offsets = [6, 0], sizes = [1, 32], strides = [1, 1]} : vector<128x32xf32> to vector<1x32xf32>
    %29 = vector.shape_cast %28 : vector<1x32xf32> to vector<1x32xf32>
    %30 = vector.broadcast %29 : vector<1x32xf32> to vector<2x32xf32>
    %c12 = arith.constant 12 : index
    %c0_11 = arith.constant 0 : index
    %31 = vector.load %arg3[%c12, %c0_11] : memref<256x32xf32, #tpu.memory_space<vmem>>, vector<2x32xf32>
    tpu.vector_store %arg3[%c12, %c0_11], %30 {strides = array<i32>} : memref<256x32xf32, #tpu.memory_space<vmem>>, vector<2x32xf32>,
    %32 = vector.extract_strided_slice %3 {offsets = [7, 0], sizes = [1, 32], strides = [1, 1]} : vector<128x32xf32> to vector<1x32xf32>
    %33 = vector.shape_cast %32 : vector<1x32xf32> to vector<1x32xf32>
    %34 = vector.broadcast %33 : vector<1x32xf32> to vector<2x32xf32>
    %c14 = arith.constant 14 : index
    %c0_12 = arith.constant 0 : index
    %35 = vector.load %arg3[%c14, %c0_12] : memref<256x32xf32, #tpu.memory_space<vmem>>, vector<2x32xf32>
    tpu.vector_store %arg3[%c14, %c0_12], %34 {strides = array<i32>} : memref<256x32xf32, #tpu.memory_space<vmem>>, vector<2x32xf32>,
    %36 = vector.extract_strided_slice %3 {offsets = [8, 0], sizes = [1, 32], strides = [1, 1]} : vector<128x32xf32> to vector<1x32xf32>
    %37 = vector.shape_cast %36 : vector<1x32xf32> to vector<1x32xf32>
    %38 = vector.broadcast %37 : vector<1x32xf32> to vector<2x32xf32>
    %c16 = arith.constant 16 : index
    %c0_13 = arith.constant 0 : index
    %39 = vector.load %arg3[%c16, %c0_13] : memref<256x32xf32, #tpu.memory_space<vmem>>, vector<2x32xf32>
    tpu.vector_store %arg3[%c16, %c0_13], %38 {strides = array<i32>} : memref<256x32xf32, #tpu.memory_space<vmem>>, vector<2x32xf32>,
    %40 = vector.extract_strided_slice %3 {offsets = [9, 0], sizes = [1, 32], strides = [1, 1]} : vector<128x32xf32> to vector<1x32xf32>
    %41 = vector.shape_cast %40 : vector<1x32xf32> to vector<1x32xf32>
    %42 = vector.broadcast %41 : vector<1x32xf32> to vector<2x32xf32>
    %c18 = arith.constant 18 : index
    %c0_14 = arith.constant 0 : index
    %43 = vector.load %arg3[%c18, %c0_14] : memref<256x32xf32, #tpu.memory_space<vmem>>, vector<2x32xf32>
    tpu.vector_store %arg3[%c18, %c0_14], %42 {strides = array<i32>} : memref<256x32xf32, #tpu.memory_space<vmem>>, vector<2x32xf32>,
    %44 = vector.extract_strided_slice %3 {offsets = [10, 0], sizes = [1, 32], strides = [1, 1]} : vector<128x32xf32> to vector<1x32xf32>
    %45 = vector.shape_cast %44 : vector<1x32xf32> to vector<1x32xf32>
    %46 = vector.broadcast %45 : vector<1x32xf32> to vector<2x32xf32>
    %c20 = arith.constant 20 : index
    %c0_15 = arith.constant 0 : index
    %47 = vector.load %arg3[%c20, %c0_15] : memref<256x32xf32, #tpu.memory_space<vmem>>, vector<2x32xf32>
    tpu.vector_store %arg3[%c20, %c0_15], %46 {strides = array<i32>} : memref<256x32xf32, #tpu.memory_space<vmem>>, vector<2x32xf32>,
    %48 = vector.extract_strided_slice %3 {offsets = [11, 0], sizes = [1, 32], strides = [1, 1]} : vector<128x32xf32> to vector<1x32xf32>
    %49 = vector.shape_cast %48 : vector<1x32xf32> to vector<1x32xf32>
    %50 = vector.broadcast %49 : vector<1x32xf32> to vector<2x32xf32>
    %c22 = arith.constant 22 : index
    %c0_16 = arith.constant 0 : index
    %51 = vector.load %arg3[%c22, %c0_16] : memref<256x32xf32, #tpu.memory_space<vmem>>, vector<2x32xf32>
    tpu.vector_store %arg3[%c22, %c0_16], %50 {strides = array<i32>} : memref<256x32xf32, #tpu.memory_space<vmem>>, vector<2x32xf32>,
    %52 = vector.extract_strided_slice %3 {offsets = [12, 0], sizes = [1, 32], strides = [1, 1]} : vector<128x32xf32> to vector<1x32xf32>
    %53 = vector.shape_cast %52 : vector<1x32xf32> to vector<1x32xf32>
    %54 = vector.broadcast %53 : vector<1x32xf32> to vector<2x32xf32>
    %c24 = arith.constant 24 : index
    %c0_17 = arith.constant 0 : index
    %55 = vector.load %arg3[%c24, %c0_17] : memref<256x32xf32, #tpu.memory_space<vmem>>, vector<2x32xf32>
    tpu.vector_store %arg3[%c24, %c0_17], %54 {strides = array<i32>} : memref<256x32xf32, #tpu.memory_space<vmem>>, vector<2x32xf32>,
    %56 = vector.extract_strided_slice %3 {offsets = [13, 0], sizes = [1, 32], strides = [1, 1]} : vector<128x32xf32> to vector<1x32xf32>
    %57 = vector.shape_cast %56 : vector<1x32xf32> to vector<1x32xf32>
    %58 = vector.broadcast %57 : vector<1x32xf32> to vector<2x32xf32>
    %c26 = arith.constant 26 : index
    %c0_18 = arith.constant 0 : index
    %59 = vector.load %arg3[%c26, %c0_18] : memref<256x32xf32, #tpu.memory_space<vmem>>, vector<2x32xf32>
    tpu.vector_store %arg3[%c26, %c0_18], %58 {strides = array<i32>} : memref<256x32xf32, #tpu.memory_space<vmem>>, vector<2x32xf32>,
    %60 = vector.extract_strided_slice %3 {offsets = [14, 0], sizes = [1, 32], strides = [1, 1]} : vector<128x32xf32> to vector<1x32xf32>
    %61 = vector.shape_cast %60 : vector<1x32xf32> to vector<1x32xf32>
    %62 = vector.broadcast %61 : vector<1x32xf32> to vector<2x32xf32>
    %c28 = arith.constant 28 : index
    %c0_19 = arith.constant 0 : index
    %63 = vector.load %arg3[%c28, %c0_19] : memref<256x32xf32, #tpu.memory_space<vmem>>, vector<2x32xf32>
    tpu.vector_store %arg3[%c28, %c0_19], %62 {strides = array<i32>} : memref<256x32xf32, #tpu.memory_space<vmem>>, vector<2x32xf32>,
    %64 = vector.extract_strided_slice %3 {offsets = [15, 0], sizes = [1, 32], strides = [1, 1]} : vector<128x32xf32> to vector<1x32xf32>
    %65 = vector.shape_cast %64 : vector<1x32xf32> to vector<1x32xf32>
    %66 = vector.broadcast %65 : vector<1x32xf32> to vector<2x32xf32>
    %c30 = arith.constant 30 : index
    %c0_20 = arith.constant 0 : index
    %67 = vector.load %arg3[%c30, %c0_20] : memref<256x32xf32, #tpu.memory_space<vmem>>, vector<2x32xf32>
    tpu.vector_store %arg3[%c30, %c0_20], %66 {strides = array<i32>} : memref<256x32xf32, #tpu.memory_space<vmem>>, vector<2x32xf32>,
    %68 = vector.extract_strided_slice %3 {offsets = [16, 0], sizes = [1, 32], strides = [1, 1]} : vector<128x32xf32> to vector<1x32xf32>
    %69 = vector.shape_cast %68 : vector<1x32xf32> to vector<1x32xf32>
    %70 = vector.broadcast %69 : vector<1x32xf32> to vector<2x32xf32>
    %c32 = arith.constant 32 : index
    %c0_21 = arith.constant 0 : index
    %71 = vector.load %arg3[%c32, %c0_21] : memref<256x32xf32, #tpu.memory_space<vmem>>, vector<2x32xf32>
    tpu.vector_store %arg3[%c32, %c0_21], %70 {strides = array<i32>} : memref<256x32xf32, #tpu.memory_space<vmem>>, vector<2x32xf32>,
    %72 = vector.extract_strided_slice %3 {offsets = [17, 0], sizes = [1, 32], strides = [1, 1]} : vector<128x32xf32> to vector<1x32xf32>
    %73 = vector.shape_cast %72 : vector<1x32xf32> to vector<1x32xf32>
    %74 = vector.broadcast %73 : vector<1x32xf32> to vector<2x32xf32>
    %c34 = arith.constant 34 : index
    %c0_22 = arith.constant 0 : index
    %75 = vector.load %arg3[%c34, %c0_22] : memref<256x32xf32, #tpu.memory_space<vmem>>, vector<2x32xf32>
    tpu.vector_store %arg3[%c34, %c0_22], %74 {strides = array<i32>} : memref<256x32xf32, #tpu.memory_space<vmem>>, vector<2x32xf32>,
    %76 = vector.extract_strided_slice %3 {offsets = [18, 0], sizes = [1, 32], strides = [1, 1]} : vector<128x32xf32> to vector<1x32xf32>
    %77 = vector.shape_cast %76 : vector<1x32xf32> to vector<1x32xf32>
    %78 = vector.broadcast %77 : vector<1x32xf32> to vector<2x32xf32>
    %c36 = arith.constant 36 : index
    %c0_23 = arith.constant 0 : index
    %79 = vector.load %arg3[%c36, %c0_23] : memref<256x32xf32, #tpu.memory_space<vmem>>, vector<2x32xf32>
    tpu.vector_store %arg3[%c36, %c0_23], %78 {strides = array<i32>} : memref<256x32xf32, #tpu.memory_space<vmem>>, vector<2x32xf32>,
    %80 = vector.extract_strided_slice %3 {offsets = [19, 0], sizes = [1, 32], strides = [1, 1]} : vector<128x32xf32> to vector<1x32xf32>
    %81 = vector.shape_cast %80 : vector<1x32xf32> to vector<1x32xf32>
    %82 = vector.broadcast %81 : vector<1x32xf32> to vector<2x32xf32>
    %c38 = arith.constant 38 : index
    %c0_24 = arith.constant 0 : index
    %83 = vector.load %arg3[%c38, %c0_24] : memref<256x32xf32, #tpu.memory_space<vmem>>, vector<2x32xf32>
    tpu.vector_store %arg3[%c38, %c0_24], %82 {strides = array<i32>} : memref<256x32xf32, #tpu.memory_space<vmem>>, vector<2x32xf32>,
    %84 = vector.extract_strided_slice %3 {offsets = [20, 0], sizes = [1, 32], strides = [1, 1]} : vector<128x32xf32> to vector<1x32xf32>
    %85 = vector.shape_cast %84 : vector<1x32xf32> to vector<1x32xf32>
    %86 = vector.broadcast %85 : vector<1x32xf32> to vector<2x32xf32>
    %c40 = arith.constant 40 : index
    %c0_25 = arith.constant 0 : index
    %87 = vector.load %arg3[%c40, %c0_25] : memref<256x32xf32, #tpu.memory_space<vmem>>, vector<2x32xf32>
    tpu.vector_store %arg3[%c40, %c0_25], %86 {strides = array<i32>} : memref<256x32xf32, #tpu.memory_space<vmem>>, vector<2x32xf32>,
    %88 = vector.extract_strided_slice %3 {offsets = [21, 0], sizes = [1, 32], strides = [1, 1]} : vector<128x32xf32> to vector<1x32xf32>
    %89 = vector.shape_cast %88 : vector<1x32xf32> to vector<1x32xf32>
    %90 = vector.broadcast %89 : vector<1x32xf32> to vector<2x32xf32>
    %c42 = arith.constant 42 : index
    %c0_26 = arith.constant 0 : index
    %91 = vector.load %arg3[%c42, %c0_26] : memref<256x32xf32, #tpu.memory_space<vmem>>, vector<2x32xf32>
    tpu.vector_store %arg3[%c42, %c0_26], %90 {strides = array<i32>} : memref<256x32xf32, #tpu.memory_space<vmem>>, vector<2x32xf32>,
    %92 = vector.extract_strided_slice %3 {offsets = [22, 0], sizes = [1, 32], strides = [1, 1]} : vector<128x32xf32> to vector<1x32xf32>
    %93 = vector.shape_cast %92 : vector<1x32xf32> to vector<1x32xf32>
    %94 = vector.broadcast %93 : vector<1x32xf32> to vector<2x32xf32>
    %c44 = arith.constant 44 : index
    %c0_27 = arith.constant 0 : index
    %95 = vector.load %arg3[%c44, %c0_27] : memref<256x32xf32, #tpu.memory_space<vmem>>, vector<2x32xf32>
    tpu.vector_store %arg3[%c44, %c0_27], %94 {strides = array<i32>} : memref<256x32xf32, #tpu.memory_space<vmem>>, vector<2x32xf32>,
    %96 = vector.extract_strided_slice %3 {offsets = [23, 0], sizes = [1, 32], strides = [1, 1]} : vector<128x32xf32> to vector<1x32xf32>
    %97 = vector.shape_cast %96 : vector<1x32xf32> to vector<1x32xf32>
    %98 = vector.broadcast %97 : vector<1x32xf32> to vector<2x32xf32>
    %c46 = arith.constant 46 : index
    %c0_28 = arith.constant 0 : index
    %99 = vector.load %arg3[%c46, %c0_28] : memref<256x32xf32, #tpu.memory_space<vmem>>, vector<2x32xf32>
    tpu.vector_store %arg3[%c46, %c0_28], %98 {strides = array<i32>} : memref<256x32xf32, #tpu.memory_space<vmem>>, vector<2x32xf32>,
    %100 = vector.extract_strided_slice %3 {offsets = [24, 0], sizes = [1, 32], strides = [1, 1]} : vector<128x32xf32> to vector<1x32xf32>
    %101 = vector.shape_cast %100 : vector<1x32xf32> to vector<1x32xf32>
    %102 = vector.broadcast %101 : vector<1x32xf32> to vector<2x32xf32>
    %c48 = arith.constant 48 : index
    %c0_29 = arith.constant 0 : index
    %103 = vector.load %arg3[%c48, %c0_29] : memref<256x32xf32, #tpu.memory_space<vmem>>, vector<2x32xf32>
    tpu.vector_store %arg3[%c48, %c0_29], %102 {strides = array<i32>} : memref<256x32xf32, #tpu.memory_space<vmem>>, vector<2x32xf32>,
    %104 = vector.extract_strided_slice %3 {offsets = [25, 0], sizes = [1, 32], strides = [1, 1]} : vector<128x32xf32> to vector<1x32xf32>
    %105 = vector.shape_cast %104 : vector<1x32xf32> to vector<1x32xf32>
    %106 = vector.broadcast %105 : vector<1x32xf32> to vector<2x32xf32>
    %c50 = arith.constant 50 : index
    %c0_30 = arith.constant 0 : index
    %107 = vector.load %arg3[%c50, %c0_30] : memref<256x32xf32, #tpu.memory_space<vmem>>, vector<2x32xf32>
    tpu.vector_store %arg3[%c50, %c0_30], %106 {strides = array<i32>} : memref<256x32xf32, #tpu.memory_space<vmem>>, vector<2x32xf32>,
    %108 = vector.extract_strided_slice %3 {offsets = [26, 0], sizes = [1, 32], strides = [1, 1]} : vector<128x32xf32> to vector<1x32xf32>
    %109 = vector.shape_cast %108 : vector<1x32xf32> to vector<1x32xf32>
    %110 = vector.broadcast %109 : vector<1x32xf32> to vector<2x32xf32>
    %c52 = arith.constant 52 : index
    %c0_31 = arith.constant 0 : index
    %111 = vector.load %arg3[%c52, %c0_31] : memref<256x32xf32, #tpu.memory_space<vmem>>, vector<2x32xf32>
    tpu.vector_store %arg3[%c52, %c0_31], %110 {strides = array<i32>} : memref<256x32xf32, #tpu.memory_space<vmem>>, vector<2x32xf32>,
    %112 = vector.extract_strided_slice %3 {offsets = [27, 0], sizes = [1, 32], strides = [1, 1]} : vector<128x32xf32> to vector<1x32xf32>
    %113 = vector.shape_cast %112 : vector<1x32xf32> to vector<1x32xf32>
    %114 = vector.broadcast %113 : vector<1x32xf32> to vector<2x32xf32>
    %c54 = arith.constant 54 : index
    %c0_32 = arith.constant 0 : index
    %115 = vector.load %arg3[%c54, %c0_32] : memref<256x32xf32, #tpu.memory_space<vmem>>, vector<2x32xf32>
    tpu.vector_store %arg3[%c54, %c0_32], %114 {strides = array<i32>} : memref<256x32xf32, #tpu.memory_space<vmem>>, vector<2x32xf32>,
    %116 = vector.extract_strided_slice %3 {offsets = [28, 0], sizes = [1, 32], strides = [1, 1]} : vector<128x32xf32> to vector<1x32xf32>
    %117 = vector.shape_cast %116 : vector<1x32xf32> to vector<1x32xf32>
    %118 = vector.broadcast %117 : vector<1x32xf32> to vector<2x32xf32>
    %c56 = arith.constant 56 : index
    %c0_33 = arith.constant 0 : index
    %119 = vector.load %arg3[%c56, %c0_33] : memref<256x32xf32, #tpu.memory_space<vmem>>, vector<2x32xf32>
    tpu.vector_store %arg3[%c56, %c0_33], %118 {strides = array<i32>} : memref<256x32xf32, #tpu.memory_space<vmem>>, vector<2x32xf32>,
    %120 = vector.extract_strided_slice %3 {offsets = [29, 0], sizes = [1, 32], strides = [1, 1]} : vector<128x32xf32> to vector<1x32xf32>
    %121 = vector.shape_cast %120 : vector<1x32xf32> to vector<1x32xf32>
    %122 = vector.broadcast %121 : vector<1x32xf32> to vector<2x32xf32>
    %c58 = arith.constant 58 : index
    %c0_34 = arith.constant 0 : index
    %123 = vector.load %arg3[%c58, %c0_34] : memref<256x32xf32, #tpu.memory_space<vmem>>, vector<2x32xf32>
    tpu.vector_store %arg3[%c58, %c0_34], %122 {strides = array<i32>} : memref<256x32xf32, #tpu.memory_space<vmem>>, vector<2x32xf32>,
    %124 = vector.extract_strided_slice %3 {offsets = [30, 0], sizes = [1, 32], strides = [1, 1]} : vector<128x32xf32> to vector<1x32xf32>
    %125 = vector.shape_cast %124 : vector<1x32xf32> to vector<1x32xf32>
    %126 = vector.broadcast %125 : vector<1x32xf32> to vector<2x32xf32>
    %c60 = arith.constant 60 : index
    %c0_35 = arith.constant 0 : index
    %127 = vector.load %arg3[%c60, %c0_35] : memref<256x32xf32, #tpu.memory_space<vmem>>, vector<2x32xf32>
    tpu.vector_store %arg3[%c60, %c0_35], %126 {strides = array<i32>} : memref<256x32xf32, #tpu.memory_space<vmem>>, vector<2x32xf32>,
    %128 = vector.extract_strided_slice %3 {offsets = [31, 0], sizes = [1, 32], strides = [1, 1]} : vector<128x32xf32> to vector<1x32xf32>
    %129 = vector.shape_cast %128 : vector<1x32xf32> to vector<1x32xf32>
    %130 = vector.broadcast %129 : vector<1x32xf32> to vector<2x32xf32>
    %c62 = arith.constant 62 : index
    %c0_36 = arith.constant 0 : index
    %131 = vector.load %arg3[%c62, %c0_36] : memref<256x32xf32, #tpu.memory_space<vmem>>, vector<2x32xf32>
    tpu.vector_store %arg3[%c62, %c0_36], %130 {strides = array<i32>} : memref<256x32xf32, #tpu.memory_space<vmem>>, vector<2x32xf32>,
    %132 = vector.extract_strided_slice %3 {offsets = [32, 0], sizes = [1, 32], strides = [1, 1]} : vector<128x32xf32> to vector<1x32xf32>
    %133 = vector.shape_cast %132 : vector<1x32xf32> to vector<1x32xf32>
    %134 = vector.broadcast %133 : vector<1x32xf32> to vector<2x32xf32>
    %c64 = arith.constant 64 : index
    %c0_37 = arith.constant 0 : index
    %135 = vector.load %arg3[%c64, %c0_37] : memref<256x32xf32, #tpu.memory_space<vmem>>, vector<2x32xf32>
    tpu.vector_store %arg3[%c64, %c0_37], %134 {strides = array<i32>} : memref<256x32xf32, #tpu.memory_space<vmem>>, vector<2x32xf32>,
    %136 = vector.extract_strided_slice %3 {offsets = [33, 0], sizes = [1, 32], strides = [1, 1]} : vector<128x32xf32> to vector<1x32xf32>
    %137 = vector.shape_cast %136 : vector<1x32xf32> to vector<1x32xf32>
    %138 = vector.broadcast %137 : vector<1x32xf32> to vector<2x32xf32>
    %c66 = arith.constant 66 : index
    %c0_38 = arith.constant 0 : index
    %139 = vector.load %arg3[%c66, %c0_38] : memref<256x32xf32, #tpu.memory_space<vmem>>, vector<2x32xf32>
    tpu.vector_store %arg3[%c66, %c0_38], %138 {strides = array<i32>} : memref<256x32xf32, #tpu.memory_space<vmem>>, vector<2x32xf32>,
    %140 = vector.extract_strided_slice %3 {offsets = [34, 0], sizes = [1, 32], strides = [1, 1]} : vector<128x32xf32> to vector<1x32xf32>
    %141 = vector.shape_cast %140 : vector<1x32xf32> to vector<1x32xf32>
    %142 = vector.broadcast %141 : vector<1x32xf32> to vector<2x32xf32>
    %c68 = arith.constant 68 : index
    %c0_39 = arith.constant 0 : index
    %143 = vector.load %arg3[%c68, %c0_39] : memref<256x32xf32, #tpu.memory_space<vmem>>, vector<2x32xf32>
    tpu.vector_store %arg3[%c68, %c0_39], %142 {strides = array<i32>} : memref<256x32xf32, #tpu.memory_space<vmem>>, vector<2x32xf32>,
    %144 = vector.extract_strided_slice %3 {offsets = [35, 0], sizes = [1, 32], strides = [1, 1]} : vector<128x32xf32> to vector<1x32xf32>
    %145 = vector.shape_cast %144 : vector<1x32xf32> to vector<1x32xf32>
    %146 = vector.broadcast %145 : vector<1x32xf32> to vector<2x32xf32>
    %c70 = arith.constant 70 : index
    %c0_40 = arith.constant 0 : index
    %147 = vector.load %arg3[%c70, %c0_40] : memref<256x32xf32, #tpu.memory_space<vmem>>, vector<2x32xf32>
    tpu.vector_store %arg3[%c70, %c0_40], %146 {strides = array<i32>} : memref<256x32xf32, #tpu.memory_space<vmem>>, vector<2x32xf32>,
    %148 = vector.extract_strided_slice %3 {offsets = [36, 0], sizes = [1, 32], strides = [1, 1]} : vector<128x32xf32> to vector<1x32xf32>
    %149 = vector.shape_cast %148 : vector<1x32xf32> to vector<1x32xf32>
    %150 = vector.broadcast %149 : vector<1x32xf32> to vector<2x32xf32>
    %c72 = arith.constant 72 : index
    %c0_41 = arith.constant 0 : index
    %151 = vector.load %arg3[%c72, %c0_41] : memref<256x32xf32, #tpu.memory_space<vmem>>, vector<2x32xf32>
    tpu.vector_store %arg3[%c72, %c0_41], %150 {strides = array<i32>} : memref<256x32xf32, #tpu.memory_space<vmem>>, vector<2x32xf32>,
    %152 = vector.extract_strided_slice %3 {offsets = [37, 0], sizes = [1, 32], strides = [1, 1]} : vector<128x32xf32> to vector<1x32xf32>
    %153 = vector.shape_cast %152 : vector<1x32xf32> to vector<1x32xf32>
    %154 = vector.broadcast %153 : vector<1x32xf32> to vector<2x32xf32>
    %c74 = arith.constant 74 : index
    %c0_42 = arith.constant 0 : index
    %155 = vector.load %arg3[%c74, %c0_42] : memref<256x32xf32, #tpu.memory_space<vmem>>, vector<2x32xf32>
    tpu.vector_store %arg3[%c74, %c0_42], %154 {strides = array<i32>} : memref<256x32xf32, #tpu.memory_space<vmem>>, vector<2x32xf32>,
    %156 = vector.extract_strided_slice %3 {offsets = [38, 0], sizes = [1, 32], strides = [1, 1]} : vector<128x32xf32> to vector<1x32xf32>
    %157 = vector.shape_cast %156 : vector<1x32xf32> to vector<1x32xf32>
    %158 = vector.broadcast %157 : vector<1x32xf32> to vector<2x32xf32>
    %c76 = arith.constant 76 : index
    %c0_43 = arith.constant 0 : index
    %159 = vector.load %arg3[%c76, %c0_43] : memref<256x32xf32, #tpu.memory_space<vmem>>, vector<2x32xf32>
    tpu.vector_store %arg3[%c76, %c0_43], %158 {strides = array<i32>} : memref<256x32xf32, #tpu.memory_space<vmem>>, vector<2x32xf32>,
    %160 = vector.extract_strided_slice %3 {offsets = [39, 0], sizes = [1, 32], strides = [1, 1]} : vector<128x32xf32> to vector<1x32xf32>
    %161 = vector.shape_cast %160 : vector<1x32xf32> to vector<1x32xf32>
    %162 = vector.broadcast %161 : vector<1x32xf32> to vector<2x32xf32>
    %c78 = arith.constant 78 : index
    %c0_44 = arith.constant 0 : index
    %163 = vector.load %arg3[%c78, %c0_44] : memref<256x32xf32, #tpu.memory_space<vmem>>, vector<2x32xf32>
    tpu.vector_store %arg3[%c78, %c0_44], %162 {strides = array<i32>} : memref<256x32xf32, #tpu.memory_space<vmem>>, vector<2x32xf32>,
    %164 = vector.extract_strided_slice %3 {offsets = [40, 0], sizes = [1, 32], strides = [1, 1]} : vector<128x32xf32> to vector<1x32xf32>
    %165 = vector.shape_cast %164 : vector<1x32xf32> to vector<1x32xf32>
    %166 = vector.broadcast %165 : vector<1x32xf32> to vector<2x32xf32>
    %c80 = arith.constant 80 : index
    %c0_45 = arith.constant 0 : index
    %167 = vector.load %arg3[%c80, %c0_45] : memref<256x32xf32, #tpu.memory_space<vmem>>, vector<2x32xf32>
    tpu.vector_store %arg3[%c80, %c0_45], %166 {strides = array<i32>} : memref<256x32xf32, #tpu.memory_space<vmem>>, vector<2x32xf32>,
    %168 = vector.extract_strided_slice %3 {offsets = [41, 0], sizes = [1, 32], strides = [1, 1]} : vector<128x32xf32> to vector<1x32xf32>
    %169 = vector.shape_cast %168 : vector<1x32xf32> to vector<1x32xf32>
    %170 = vector.broadcast %169 : vector<1x32xf32> to vector<2x32xf32>
    %c82 = arith.constant 82 : index
    %c0_46 = arith.constant 0 : index
    %171 = vector.load %arg3[%c82, %c0_46] : memref<256x32xf32, #tpu.memory_space<vmem>>, vector<2x32xf32>
    tpu.vector_store %arg3[%c82, %c0_46], %170 {strides = array<i32>} : memref<256x32xf32, #tpu.memory_space<vmem>>, vector<2x32xf32>,
    %172 = vector.extract_strided_slice %3 {offsets = [42, 0], sizes = [1, 32], strides = [1, 1]} : vector<128x32xf32> to vector<1x32xf32>
    %173 = vector.shape_cast %172 : vector<1x32xf32> to vector<1x32xf32>
    %174 = vector.broadcast %173 : vector<1x32xf32> to vector<2x32xf32>
    %c84 = arith.constant 84 : index
    %c0_47 = arith.constant 0 : index
    %175 = vector.load %arg3[%c84, %c0_47] : memref<256x32xf32, #tpu.memory_space<vmem>>, vector<2x32xf32>
    tpu.vector_store %arg3[%c84, %c0_47], %174 {strides = array<i32>} : memref<256x32xf32, #tpu.memory_space<vmem>>, vector<2x32xf32>,
    %176 = vector.extract_strided_slice %3 {offsets = [43, 0], sizes = [1, 32], strides = [1, 1]} : vector<128x32xf32> to vector<1x32xf32>
    %177 = vector.shape_cast %176 : vector<1x32xf32> to vector<1x32xf32>
    %178 = vector.broadcast %177 : vector<1x32xf32> to vector<2x32xf32>
    %c86 = arith.constant 86 : index
    %c0_48 = arith.constant 0 : index
    %179 = vector.load %arg3[%c86, %c0_48] : memref<256x32xf32, #tpu.memory_space<vmem>>, vector<2x32xf32>
    tpu.vector_store %arg3[%c86, %c0_48], %178 {strides = array<i32>} : memref<256x32xf32, #tpu.memory_space<vmem>>, vector<2x32xf32>,
    %180 = vector.extract_strided_slice %3 {offsets = [44, 0], sizes = [1, 32], strides = [1, 1]} : vector<128x32xf32> to vector<1x32xf32>
    %181 = vector.shape_cast %180 : vector<1x32xf32> to vector<1x32xf32>
    %182 = vector.broadcast %181 : vector<1x32xf32> to vector<2x32xf32>
    %c88 = arith.constant 88 : index
    %c0_49 = arith.constant 0 : index
    %183 = vector.load %arg3[%c88, %c0_49] : memref<256x32xf32, #tpu.memory_space<vmem>>, vector<2x32xf32>
    tpu.vector_store %arg3[%c88, %c0_49], %182 {strides = array<i32>} : memref<256x32xf32, #tpu.memory_space<vmem>>, vector<2x32xf32>,
    %184 = vector.extract_strided_slice %3 {offsets = [45, 0], sizes = [1, 32], strides = [1, 1]} : vector<128x32xf32> to vector<1x32xf32>
    %185 = vector.shape_cast %184 : vector<1x32xf32> to vector<1x32xf32>
    %186 = vector.broadcast %185 : vector<1x32xf32> to vector<2x32xf32>
    %c90 = arith.constant 90 : index
    %c0_50 = arith.constant 0 : index
    %187 = vector.load %arg3[%c90, %c0_50] : memref<256x32xf32, #tpu.memory_space<vmem>>, vector<2x32xf32>
    tpu.vector_store %arg3[%c90, %c0_50], %186 {strides = array<i32>} : memref<256x32xf32, #tpu.memory_space<vmem>>, vector<2x32xf32>,
    %188 = vector.extract_strided_slice %3 {offsets = [46, 0], sizes = [1, 32], strides = [1, 1]} : vector<128x32xf32> to vector<1x32xf32>
    %189 = vector.shape_cast %188 : vector<1x32xf32> to vector<1x32xf32>
    %190 = vector.broadcast %189 : vector<1x32xf32> to vector<2x32xf32>
    %c92 = arith.constant 92 : index
    %c0_51 = arith.constant 0 : index
    %191 = vector.load %arg3[%c92, %c0_51] : memref<256x32xf32, #tpu.memory_space<vmem>>, vector<2x32xf32>
    tpu.vector_store %arg3[%c92, %c0_51], %190 {strides = array<i32>} : memref<256x32xf32, #tpu.memory_space<vmem>>, vector<2x32xf32>,
    %192 = vector.extract_strided_slice %3 {offsets = [47, 0], sizes = [1, 32], strides = [1, 1]} : vector<128x32xf32> to vector<1x32xf32>
    %193 = vector.shape_cast %192 : vector<1x32xf32> to vector<1x32xf32>
    %194 = vector.broadcast %193 : vector<1x32xf32> to vector<2x32xf32>
    %c94 = arith.constant 94 : index
    %c0_52 = arith.constant 0 : index
    %195 = vector.load %arg3[%c94, %c0_52] : memref<256x32xf32, #tpu.memory_space<vmem>>, vector<2x32xf32>
    tpu.vector_store %arg3[%c94, %c0_52], %194 {strides = array<i32>} : memref<256x32xf32, #tpu.memory_space<vmem>>, vector<2x32xf32>,
    %196 = vector.extract_strided_slice %3 {offsets = [48, 0], sizes = [1, 32], strides = [1, 1]} : vector<128x32xf32> to vector<1x32xf32>
    %197 = vector.shape_cast %196 : vector<1x32xf32> to vector<1x32xf32>
    %198 = vector.broadcast %197 : vector<1x32xf32> to vector<2x32xf32>
    %c96 = arith.constant 96 : index
    %c0_53 = arith.constant 0 : index
    %199 = vector.load %arg3[%c96, %c0_53] : memref<256x32xf32, #tpu.memory_space<vmem>>, vector<2x32xf32>
    tpu.vector_store %arg3[%c96, %c0_53], %198 {strides = array<i32>} : memref<256x32xf32, #tpu.memory_space<vmem>>, vector<2x32xf32>,
    %200 = vector.extract_strided_slice %3 {offsets = [49, 0], sizes = [1, 32], strides = [1, 1]} : vector<128x32xf32> to vector<1x32xf32>
    %201 = vector.shape_cast %200 : vector<1x32xf32> to vector<1x32xf32>
    %202 = vector.broadcast %201 : vector<1x32xf32> to vector<2x32xf32>
    %c98 = arith.constant 98 : index
    %c0_54 = arith.constant 0 : index
    %203 = vector.load %arg3[%c98, %c0_54] : memref<256x32xf32, #tpu.memory_space<vmem>>, vector<2x32xf32>
    tpu.vector_store %arg3[%c98, %c0_54], %202 {strides = array<i32>} : memref<256x32xf32, #tpu.memory_space<vmem>>, vector<2x32xf32>,
    %204 = vector.extract_strided_slice %3 {offsets = [50, 0], sizes = [1, 32], strides = [1, 1]} : vector<128x32xf32> to vector<1x32xf32>
    %205 = vector.shape_cast %204 : vector<1x32xf32> to vector<1x32xf32>
    %206 = vector.broadcast %205 : vector<1x32xf32> to vector<2x32xf32>
    %c100 = arith.constant 100 : index
    %c0_55 = arith.constant 0 : index
    %207 = vector.load %arg3[%c100, %c0_55] : memref<256x32xf32, #tpu.memory_space<vmem>>, vector<2x32xf32>
    tpu.vector_store %arg3[%c100, %c0_55], %206 {strides = array<i32>} : memref<256x32xf32, #tpu.memory_space<vmem>>, vector<2x32xf32>,
    %208 = vector.extract_strided_slice %3 {offsets = [51, 0], sizes = [1, 32], strides = [1, 1]} : vector<128x32xf32> to vector<1x32xf32>
    %209 = vector.shape_cast %208 : vector<1x32xf32> to vector<1x32xf32>
    %210 = vector.broadcast %209 : vector<1x32xf32> to vector<2x32xf32>
    %c102 = arith.constant 102 : index
    %c0_56 = arith.constant 0 : index
    %211 = vector.load %arg3[%c102, %c0_56] : memref<256x32xf32, #tpu.memory_space<vmem>>, vector<2x32xf32>
    tpu.vector_store %arg3[%c102, %c0_56], %210 {strides = array<i32>} : memref<256x32xf32, #tpu.memory_space<vmem>>, vector<2x32xf32>,
    %212 = vector.extract_strided_slice %3 {offsets = [52, 0], sizes = [1, 32], strides = [1, 1]} : vector<128x32xf32> to vector<1x32xf32>
    %213 = vector.shape_cast %212 : vector<1x32xf32> to vector<1x32xf32>
    %214 = vector.broadcast %213 : vector<1x32xf32> to vector<2x32xf32>
    %c104 = arith.constant 104 : index
    %c0_57 = arith.constant 0 : index
    %215 = vector.load %arg3[%c104, %c0_57] : memref<256x32xf32, #tpu.memory_space<vmem>>, vector<2x32xf32>
    tpu.vector_store %arg3[%c104, %c0_57], %214 {strides = array<i32>} : memref<256x32xf32, #tpu.memory_space<vmem>>, vector<2x32xf32>,
    %216 = vector.extract_strided_slice %3 {offsets = [53, 0], sizes = [1, 32], strides = [1, 1]} : vector<128x32xf32> to vector<1x32xf32>
    %217 = vector.shape_cast %216 : vector<1x32xf32> to vector<1x32xf32>
    %218 = vector.broadcast %217 : vector<1x32xf32> to vector<2x32xf32>
    %c106 = arith.constant 106 : index
    %c0_58 = arith.constant 0 : index
    %219 = vector.load %arg3[%c106, %c0_58] : memref<256x32xf32, #tpu.memory_space<vmem>>, vector<2x32xf32>
    tpu.vector_store %arg3[%c106, %c0_58], %218 {strides = array<i32>} : memref<256x32xf32, #tpu.memory_space<vmem>>, vector<2x32xf32>,
    %220 = vector.extract_strided_slice %3 {offsets = [54, 0], sizes = [1, 32], strides = [1, 1]} : vector<128x32xf32> to vector<1x32xf32>
    %221 = vector.shape_cast %220 : vector<1x32xf32> to vector<1x32xf32>
    %222 = vector.broadcast %221 : vector<1x32xf32> to vector<2x32xf32>
    %c108 = arith.constant 108 : index
    %c0_59 = arith.constant 0 : index
    %223 = vector.load %arg3[%c108, %c0_59] : memref<256x32xf32, #tpu.memory_space<vmem>>, vector<2x32xf32>
    tpu.vector_store %arg3[%c108, %c0_59], %222 {strides = array<i32>} : memref<256x32xf32, #tpu.memory_space<vmem>>, vector<2x32xf32>,
    %224 = vector.extract_strided_slice %3 {offsets = [55, 0], sizes = [1, 32], strides = [1, 1]} : vector<128x32xf32> to vector<1x32xf32>
    %225 = vector.shape_cast %224 : vector<1x32xf32> to vector<1x32xf32>
    %226 = vector.broadcast %225 : vector<1x32xf32> to vector<2x32xf32>
    %c110 = arith.constant 110 : index
    %c0_60 = arith.constant 0 : index
    %227 = vector.load %arg3[%c110, %c0_60] : memref<256x32xf32, #tpu.memory_space<vmem>>, vector<2x32xf32>
    tpu.vector_store %arg3[%c110, %c0_60], %226 {strides = array<i32>} : memref<256x32xf32, #tpu.memory_space<vmem>>, vector<2x32xf32>,
    %228 = vector.extract_strided_slice %3 {offsets = [56, 0], sizes = [1, 32], strides = [1, 1]} : vector<128x32xf32> to vector<1x32xf32>
    %229 = vector.shape_cast %228 : vector<1x32xf32> to vector<1x32xf32>
    %230 = vector.broadcast %229 : vector<1x32xf32> to vector<2x32xf32>
    %c112 = arith.constant 112 : index
    %c0_61 = arith.constant 0 : index
    %231 = vector.load %arg3[%c112, %c0_61] : memref<256x32xf32, #tpu.memory_space<vmem>>, vector<2x32xf32>
    tpu.vector_store %arg3[%c112, %c0_61], %230 {strides = array<i32>} : memref<256x32xf32, #tpu.memory_space<vmem>>, vector<2x32xf32>,
    %232 = vector.extract_strided_slice %3 {offsets = [57, 0], sizes = [1, 32], strides = [1, 1]} : vector<128x32xf32> to vector<1x32xf32>
    %233 = vector.shape_cast %232 : vector<1x32xf32> to vector<1x32xf32>
    %234 = vector.broadcast %233 : vector<1x32xf32> to vector<2x32xf32>
    %c114 = arith.constant 114 : index
    %c0_62 = arith.constant 0 : index
    %235 = vector.load %arg3[%c114, %c0_62] : memref<256x32xf32, #tpu.memory_space<vmem>>, vector<2x32xf32>
    tpu.vector_store %arg3[%c114, %c0_62], %234 {strides = array<i32>} : memref<256x32xf32, #tpu.memory_space<vmem>>, vector<2x32xf32>,
    %236 = vector.extract_strided_slice %3 {offsets = [58, 0], sizes = [1, 32], strides = [1, 1]} : vector<128x32xf32> to vector<1x32xf32>
    %237 = vector.shape_cast %236 : vector<1x32xf32> to vector<1x32xf32>
    %238 = vector.broadcast %237 : vector<1x32xf32> to vector<2x32xf32>
    %c116 = arith.constant 116 : index
    %c0_63 = arith.constant 0 : index
    %239 = vector.load %arg3[%c116, %c0_63] : memref<256x32xf32, #tpu.memory_space<vmem>>, vector<2x32xf32>
    tpu.vector_store %arg3[%c116, %c0_63], %238 {strides = array<i32>} : memref<256x32xf32, #tpu.memory_space<vmem>>, vector<2x32xf32>,
    %240 = vector.extract_strided_slice %3 {offsets = [59, 0], sizes = [1, 32], strides = [1, 1]} : vector<128x32xf32> to vector<1x32xf32>
    %241 = vector.shape_cast %240 : vector<1x32xf32> to vector<1x32xf32>
    %242 = vector.broadcast %241 : vector<1x32xf32> to vector<2x32xf32>
    %c118 = arith.constant 118 : index
    %c0_64 = arith.constant 0 : index
    %243 = vector.load %arg3[%c118, %c0_64] : memref<256x32xf32, #tpu.memory_space<vmem>>, vector<2x32xf32>
    tpu.vector_store %arg3[%c118, %c0_64], %242 {strides = array<i32>} : memref<256x32xf32, #tpu.memory_space<vmem>>, vector<2x32xf32>,
    %244 = vector.extract_strided_slice %3 {offsets = [60, 0], sizes = [1, 32], strides = [1, 1]} : vector<128x32xf32> to vector<1x32xf32>
    %245 = vector.shape_cast %244 : vector<1x32xf32> to vector<1x32xf32>
    %246 = vector.broadcast %245 : vector<1x32xf32> to vector<2x32xf32>
    %c120 = arith.constant 120 : index
    %c0_65 = arith.constant 0 : index
    %247 = vector.load %arg3[%c120, %c0_65] : memref<256x32xf32, #tpu.memory_space<vmem>>, vector<2x32xf32>
    tpu.vector_store %arg3[%c120, %c0_65], %246 {strides = array<i32>} : memref<256x32xf32, #tpu.memory_space<vmem>>, vector<2x32xf32>,
    %248 = vector.extract_strided_slice %3 {offsets = [61, 0], sizes = [1, 32], strides = [1, 1]} : vector<128x32xf32> to vector<1x32xf32>
    %249 = vector.shape_cast %248 : vector<1x32xf32> to vector<1x32xf32>
    %250 = vector.broadcast %249 : vector<1x32xf32> to vector<2x32xf32>
    %c122 = arith.constant 122 : index
    %c0_66 = arith.constant 0 : index
    %251 = vector.load %arg3[%c122, %c0_66] : memref<256x32xf32, #tpu.memory_space<vmem>>, vector<2x32xf32>
    tpu.vector_store %arg3[%c122, %c0_66], %250 {strides = array<i32>} : memref<256x32xf32, #tpu.memory_space<vmem>>, vector<2x32xf32>,
    %252 = vector.extract_strided_slice %3 {offsets = [62, 0], sizes = [1, 32], strides = [1, 1]} : vector<128x32xf32> to vector<1x32xf32>
    %253 = vector.shape_cast %252 : vector<1x32xf32> to vector<1x32xf32>
    %254 = vector.broadcast %253 : vector<1x32xf32> to vector<2x32xf32>
    %c124 = arith.constant 124 : index
    %c0_67 = arith.constant 0 : index
    %255 = vector.load %arg3[%c124, %c0_67] : memref<256x32xf32, #tpu.memory_space<vmem>>, vector<2x32xf32>
    tpu.vector_store %arg3[%c124, %c0_67], %254 {strides = array<i32>} : memref<256x32xf32, #tpu.memory_space<vmem>>, vector<2x32xf32>,
    %256 = vector.extract_strided_slice %3 {offsets = [63, 0], sizes = [1, 32], strides = [1, 1]} : vector<128x32xf32> to vector<1x32xf32>
    %257 = vector.shape_cast %256 : vector<1x32xf32> to vector<1x32xf32>
    %258 = vector.broadcast %257 : vector<1x32xf32> to vector<2x32xf32>
    %c126 = arith.constant 126 : index
    %c0_68 = arith.constant 0 : index
    %259 = vector.load %arg3[%c126, %c0_68] : memref<256x32xf32, #tpu.memory_space<vmem>>, vector<2x32xf32>
    tpu.vector_store %arg3[%c126, %c0_68], %258 {strides = array<i32>} : memref<256x32xf32, #tpu.memory_space<vmem>>, vector<2x32xf32>,
    %260 = vector.extract_strided_slice %3 {offsets = [64, 0], sizes = [1, 32], strides = [1, 1]} : vector<128x32xf32> to vector<1x32xf32>
    %261 = vector.shape_cast %260 : vector<1x32xf32> to vector<1x32xf32>
    %262 = vector.broadcast %261 : vector<1x32xf32> to vector<2x32xf32>
    %c128 = arith.constant 128 : index
    %c0_69 = arith.constant 0 : index
    %263 = vector.load %arg3[%c128, %c0_69] : memref<256x32xf32, #tpu.memory_space<vmem>>, vector<2x32xf32>
    tpu.vector_store %arg3[%c128, %c0_69], %262 {strides = array<i32>} : memref<256x32xf32, #tpu.memory_space<vmem>>, vector<2x32xf32>,
    %264 = vector.extract_strided_slice %3 {offsets = [65, 0], sizes = [1, 32], strides = [1, 1]} : vector<128x32xf32> to vector<1x32xf32>
    %265 = vector.shape_cast %264 : vector<1x32xf32> to vector<1x32xf32>
    %266 = vector.broadcast %265 : vector<1x32xf32> to vector<2x32xf32>
    %c130 = arith.constant 130 : index
    %c0_70 = arith.constant 0 : index
    %267 = vector.load %arg3[%c130, %c0_70] : memref<256x32xf32, #tpu.memory_space<vmem>>, vector<2x32xf32>
    tpu.vector_store %arg3[%c130, %c0_70], %266 {strides = array<i32>} : memref<256x32xf32, #tpu.memory_space<vmem>>, vector<2x32xf32>,
    %268 = vector.extract_strided_slice %3 {offsets = [66, 0], sizes = [1, 32], strides = [1, 1]} : vector<128x32xf32> to vector<1x32xf32>
    %269 = vector.shape_cast %268 : vector<1x32xf32> to vector<1x32xf32>
    %270 = vector.broadcast %269 : vector<1x32xf32> to vector<2x32xf32>
    %c132 = arith.constant 132 : index
    %c0_71 = arith.constant 0 : index
    %271 = vector.load %arg3[%c132, %c0_71] : memref<256x32xf32, #tpu.memory_space<vmem>>, vector<2x32xf32>
    tpu.vector_store %arg3[%c132, %c0_71], %270 {strides = array<i32>} : memref<256x32xf32, #tpu.memory_space<vmem>>, vector<2x32xf32>,
    %272 = vector.extract_strided_slice %3 {offsets = [67, 0], sizes = [1, 32], strides = [1, 1]} : vector<128x32xf32> to vector<1x32xf32>
    %273 = vector.shape_cast %272 : vector<1x32xf32> to vector<1x32xf32>
    %274 = vector.broadcast %273 : vector<1x32xf32> to vector<2x32xf32>
    %c134 = arith.constant 134 : index
    %c0_72 = arith.constant 0 : index
    %275 = vector.load %arg3[%c134, %c0_72] : memref<256x32xf32, #tpu.memory_space<vmem>>, vector<2x32xf32>
    tpu.vector_store %arg3[%c134, %c0_72], %274 {strides = array<i32>} : memref<256x32xf32, #tpu.memory_space<vmem>>, vector<2x32xf32>,
    %276 = vector.extract_strided_slice %3 {offsets = [68, 0], sizes = [1, 32], strides = [1, 1]} : vector<128x32xf32> to vector<1x32xf32>
    %277 = vector.shape_cast %276 : vector<1x32xf32> to vector<1x32xf32>
    %278 = vector.broadcast %277 : vector<1x32xf32> to vector<2x32xf32>
    %c136 = arith.constant 136 : index
    %c0_73 = arith.constant 0 : index
    %279 = vector.load %arg3[%c136, %c0_73] : memref<256x32xf32, #tpu.memory_space<vmem>>, vector<2x32xf32>
    tpu.vector_store %arg3[%c136, %c0_73], %278 {strides = array<i32>} : memref<256x32xf32, #tpu.memory_space<vmem>>, vector<2x32xf32>,
    %280 = vector.extract_strided_slice %3 {offsets = [69, 0], sizes = [1, 32], strides = [1, 1]} : vector<128x32xf32> to vector<1x32xf32>
    %281 = vector.shape_cast %280 : vector<1x32xf32> to vector<1x32xf32>
    %282 = vector.broadcast %281 : vector<1x32xf32> to vector<2x32xf32>
    %c138 = arith.constant 138 : index
    %c0_74 = arith.constant 0 : index
    %283 = vector.load %arg3[%c138, %c0_74] : memref<256x32xf32, #tpu.memory_space<vmem>>, vector<2x32xf32>
    tpu.vector_store %arg3[%c138, %c0_74], %282 {strides = array<i32>} : memref<256x32xf32, #tpu.memory_space<vmem>>, vector<2x32xf32>,
    %284 = vector.extract_strided_slice %3 {offsets = [70, 0], sizes = [1, 32], strides = [1, 1]} : vector<128x32xf32> to vector<1x32xf32>
    %285 = vector.shape_cast %284 : vector<1x32xf32> to vector<1x32xf32>
    %286 = vector.broadcast %285 : vector<1x32xf32> to vector<2x32xf32>
    %c140 = arith.constant 140 : index
    %c0_75 = arith.constant 0 : index
    %287 = vector.load %arg3[%c140, %c0_75] : memref<256x32xf32, #tpu.memory_space<vmem>>, vector<2x32xf32>
    tpu.vector_store %arg3[%c140, %c0_75], %286 {strides = array<i32>} : memref<256x32xf32, #tpu.memory_space<vmem>>, vector<2x32xf32>,
    %288 = vector.extract_strided_slice %3 {offsets = [71, 0], sizes = [1, 32], strides = [1, 1]} : vector<128x32xf32> to vector<1x32xf32>
    %289 = vector.shape_cast %288 : vector<1x32xf32> to vector<1x32xf32>
    %290 = vector.broadcast %289 : vector<1x32xf32> to vector<2x32xf32>
    %c142 = arith.constant 142 : index
    %c0_76 = arith.constant 0 : index
    %291 = vector.load %arg3[%c142, %c0_76] : memref<256x32xf32, #tpu.memory_space<vmem>>, vector<2x32xf32>
    tpu.vector_store %arg3[%c142, %c0_76], %290 {strides = array<i32>} : memref<256x32xf32, #tpu.memory_space<vmem>>, vector<2x32xf32>,
    %292 = vector.extract_strided_slice %3 {offsets = [72, 0], sizes = [1, 32], strides = [1, 1]} : vector<128x32xf32> to vector<1x32xf32>
    %293 = vector.shape_cast %292 : vector<1x32xf32> to vector<1x32xf32>
    %294 = vector.broadcast %293 : vector<1x32xf32> to vector<2x32xf32>
    %c144 = arith.constant 144 : index
    %c0_77 = arith.constant 0 : index
    %295 = vector.load %arg3[%c144, %c0_77] : memref<256x32xf32, #tpu.memory_space<vmem>>, vector<2x32xf32>
    tpu.vector_store %arg3[%c144, %c0_77], %294 {strides = array<i32>} : memref<256x32xf32, #tpu.memory_space<vmem>>, vector<2x32xf32>,
    %296 = vector.extract_strided_slice %3 {offsets = [73, 0], sizes = [1, 32], strides = [1, 1]} : vector<128x32xf32> to vector<1x32xf32>
    %297 = vector.shape_cast %296 : vector<1x32xf32> to vector<1x32xf32>
    %298 = vector.broadcast %297 : vector<1x32xf32> to vector<2x32xf32>
    %c146 = arith.constant 146 : index
    %c0_78 = arith.constant 0 : index
    %299 = vector.load %arg3[%c146, %c0_78] : memref<256x32xf32, #tpu.memory_space<vmem>>, vector<2x32xf32>
    tpu.vector_store %arg3[%c146, %c0_78], %298 {strides = array<i32>} : memref<256x32xf32, #tpu.memory_space<vmem>>, vector<2x32xf32>,
    %300 = vector.extract_strided_slice %3 {offsets = [74, 0], sizes = [1, 32], strides = [1, 1]} : vector<128x32xf32> to vector<1x32xf32>
    %301 = vector.shape_cast %300 : vector<1x32xf32> to vector<1x32xf32>
    %302 = vector.broadcast %301 : vector<1x32xf32> to vector<2x32xf32>
    %c148 = arith.constant 148 : index
    %c0_79 = arith.constant 0 : index
    %303 = vector.load %arg3[%c148, %c0_79] : memref<256x32xf32, #tpu.memory_space<vmem>>, vector<2x32xf32>
    tpu.vector_store %arg3[%c148, %c0_79], %302 {strides = array<i32>} : memref<256x32xf32, #tpu.memory_space<vmem>>, vector<2x32xf32>,
    %304 = vector.extract_strided_slice %3 {offsets = [75, 0], sizes = [1, 32], strides = [1, 1]} : vector<128x32xf32> to vector<1x32xf32>
    %305 = vector.shape_cast %304 : vector<1x32xf32> to vector<1x32xf32>
    %306 = vector.broadcast %305 : vector<1x32xf32> to vector<2x32xf32>
    %c150 = arith.constant 150 : index
    %c0_80 = arith.constant 0 : index
    %307 = vector.load %arg3[%c150, %c0_80] : memref<256x32xf32, #tpu.memory_space<vmem>>, vector<2x32xf32>
    tpu.vector_store %arg3[%c150, %c0_80], %306 {strides = array<i32>} : memref<256x32xf32, #tpu.memory_space<vmem>>, vector<2x32xf32>,
    %308 = vector.extract_strided_slice %3 {offsets = [76, 0], sizes = [1, 32], strides = [1, 1]} : vector<128x32xf32> to vector<1x32xf32>
    %309 = vector.shape_cast %308 : vector<1x32xf32> to vector<1x32xf32>
    %310 = vector.broadcast %309 : vector<1x32xf32> to vector<2x32xf32>
    %c152 = arith.constant 152 : index
    %c0_81 = arith.constant 0 : index
    %311 = vector.load %arg3[%c152, %c0_81] : memref<256x32xf32, #tpu.memory_space<vmem>>, vector<2x32xf32>
    tpu.vector_store %arg3[%c152, %c0_81], %310 {strides = array<i32>} : memref<256x32xf32, #tpu.memory_space<vmem>>, vector<2x32xf32>,
    %312 = vector.extract_strided_slice %3 {offsets = [77, 0], sizes = [1, 32], strides = [1, 1]} : vector<128x32xf32> to vector<1x32xf32>
    %313 = vector.shape_cast %312 : vector<1x32xf32> to vector<1x32xf32>
    %314 = vector.broadcast %313 : vector<1x32xf32> to vector<2x32xf32>
    %c154 = arith.constant 154 : index
    %c0_82 = arith.constant 0 : index
    %315 = vector.load %arg3[%c154, %c0_82] : memref<256x32xf32, #tpu.memory_space<vmem>>, vector<2x32xf32>
    tpu.vector_store %arg3[%c154, %c0_82], %314 {strides = array<i32>} : memref<256x32xf32, #tpu.memory_space<vmem>>, vector<2x32xf32>,
    %316 = vector.extract_strided_slice %3 {offsets = [78, 0], sizes = [1, 32], strides = [1, 1]} : vector<128x32xf32> to vector<1x32xf32>
    %317 = vector.shape_cast %316 : vector<1x32xf32> to vector<1x32xf32>
    %318 = vector.broadcast %317 : vector<1x32xf32> to vector<2x32xf32>
    %c156 = arith.constant 156 : index
    %c0_83 = arith.constant 0 : index
    %319 = vector.load %arg3[%c156, %c0_83] : memref<256x32xf32, #tpu.memory_space<vmem>>, vector<2x32xf32>
    tpu.vector_store %arg3[%c156, %c0_83], %318 {strides = array<i32>} : memref<256x32xf32, #tpu.memory_space<vmem>>, vector<2x32xf32>,
    %320 = vector.extract_strided_slice %3 {offsets = [79, 0], sizes = [1, 32], strides = [1, 1]} : vector<128x32xf32> to vector<1x32xf32>
    %321 = vector.shape_cast %320 : vector<1x32xf32> to vector<1x32xf32>
    %322 = vector.broadcast %321 : vector<1x32xf32> to vector<2x32xf32>
    %c158 = arith.constant 158 : index
    %c0_84 = arith.constant 0 : index
    %323 = vector.load %arg3[%c158, %c0_84] : memref<256x32xf32, #tpu.memory_space<vmem>>, vector<2x32xf32>
    tpu.vector_store %arg3[%c158, %c0_84], %322 {strides = array<i32>} : memref<256x32xf32, #tpu.memory_space<vmem>>, vector<2x32xf32>,
    %324 = vector.extract_strided_slice %3 {offsets = [80, 0], sizes = [1, 32], strides = [1, 1]} : vector<128x32xf32> to vector<1x32xf32>
    %325 = vector.shape_cast %324 : vector<1x32xf32> to vector<1x32xf32>
    %326 = vector.broadcast %325 : vector<1x32xf32> to vector<2x32xf32>
    %c160 = arith.constant 160 : index
    %c0_85 = arith.constant 0 : index
    %327 = vector.load %arg3[%c160, %c0_85] : memref<256x32xf32, #tpu.memory_space<vmem>>, vector<2x32xf32>
    tpu.vector_store %arg3[%c160, %c0_85], %326 {strides = array<i32>} : memref<256x32xf32, #tpu.memory_space<vmem>>, vector<2x32xf32>,
    %328 = vector.extract_strided_slice %3 {offsets = [81, 0], sizes = [1, 32], strides = [1, 1]} : vector<128x32xf32> to vector<1x32xf32>
    %329 = vector.shape_cast %328 : vector<1x32xf32> to vector<1x32xf32>
    %330 = vector.broadcast %329 : vector<1x32xf32> to vector<2x32xf32>
    %c162 = arith.constant 162 : index
    %c0_86 = arith.constant 0 : index
    %331 = vector.load %arg3[%c162, %c0_86] : memref<256x32xf32, #tpu.memory_space<vmem>>, vector<2x32xf32>
    tpu.vector_store %arg3[%c162, %c0_86], %330 {strides = array<i32>} : memref<256x32xf32, #tpu.memory_space<vmem>>, vector<2x32xf32>,
    %332 = vector.extract_strided_slice %3 {offsets = [82, 0], sizes = [1, 32], strides = [1, 1]} : vector<128x32xf32> to vector<1x32xf32>
    %333 = vector.shape_cast %332 : vector<1x32xf32> to vector<1x32xf32>
    %334 = vector.broadcast %333 : vector<1x32xf32> to vector<2x32xf32>
    %c164 = arith.constant 164 : index
    %c0_87 = arith.constant 0 : index
    %335 = vector.load %arg3[%c164, %c0_87] : memref<256x32xf32, #tpu.memory_space<vmem>>, vector<2x32xf32>
    tpu.vector_store %arg3[%c164, %c0_87], %334 {strides = array<i32>} : memref<256x32xf32, #tpu.memory_space<vmem>>, vector<2x32xf32>,
    %336 = vector.extract_strided_slice %3 {offsets = [83, 0], sizes = [1, 32], strides = [1, 1]} : vector<128x32xf32> to vector<1x32xf32>
    %337 = vector.shape_cast %336 : vector<1x32xf32> to vector<1x32xf32>
    %338 = vector.broadcast %337 : vector<1x32xf32> to vector<2x32xf32>
    %c166 = arith.constant 166 : index
    %c0_88 = arith.constant 0 : index
    %339 = vector.load %arg3[%c166, %c0_88] : memref<256x32xf32, #tpu.memory_space<vmem>>, vector<2x32xf32>
    tpu.vector_store %arg3[%c166, %c0_88], %338 {strides = array<i32>} : memref<256x32xf32, #tpu.memory_space<vmem>>, vector<2x32xf32>,
    %340 = vector.extract_strided_slice %3 {offsets = [84, 0], sizes = [1, 32], strides = [1, 1]} : vector<128x32xf32> to vector<1x32xf32>
    %341 = vector.shape_cast %340 : vector<1x32xf32> to vector<1x32xf32>
    %342 = vector.broadcast %341 : vector<1x32xf32> to vector<2x32xf32>
    %c168 = arith.constant 168 : index
    %c0_89 = arith.constant 0 : index
    %343 = vector.load %arg3[%c168, %c0_89] : memref<256x32xf32, #tpu.memory_space<vmem>>, vector<2x32xf32>
    tpu.vector_store %arg3[%c168, %c0_89], %342 {strides = array<i32>} : memref<256x32xf32, #tpu.memory_space<vmem>>, vector<2x32xf32>,
    %344 = vector.extract_strided_slice %3 {offsets = [85, 0], sizes = [1, 32], strides = [1, 1]} : vector<128x32xf32> to vector<1x32xf32>
    %345 = vector.shape_cast %344 : vector<1x32xf32> to vector<1x32xf32>
    %346 = vector.broadcast %345 : vector<1x32xf32> to vector<2x32xf32>
    %c170 = arith.constant 170 : index
    %c0_90 = arith.constant 0 : index
    %347 = vector.load %arg3[%c170, %c0_90] : memref<256x32xf32, #tpu.memory_space<vmem>>, vector<2x32xf32>
    tpu.vector_store %arg3[%c170, %c0_90], %346 {strides = array<i32>} : memref<256x32xf32, #tpu.memory_space<vmem>>, vector<2x32xf32>,
    %348 = vector.extract_strided_slice %3 {offsets = [86, 0], sizes = [1, 32], strides = [1, 1]} : vector<128x32xf32> to vector<1x32xf32>
    %349 = vector.shape_cast %348 : vector<1x32xf32> to vector<1x32xf32>
    %350 = vector.broadcast %349 : vector<1x32xf32> to vector<2x32xf32>
    %c172 = arith.constant 172 : index
    %c0_91 = arith.constant 0 : index
    %351 = vector.load %arg3[%c172, %c0_91] : memref<256x32xf32, #tpu.memory_space<vmem>>, vector<2x32xf32>
    tpu.vector_store %arg3[%c172, %c0_91], %350 {strides = array<i32>} : memref<256x32xf32, #tpu.memory_space<vmem>>, vector<2x32xf32>,
    %352 = vector.extract_strided_slice %3 {offsets = [87, 0], sizes = [1, 32], strides = [1, 1]} : vector<128x32xf32> to vector<1x32xf32>
    %353 = vector.shape_cast %352 : vector<1x32xf32> to vector<1x32xf32>
    %354 = vector.broadcast %353 : vector<1x32xf32> to vector<2x32xf32>
    %c174 = arith.constant 174 : index
    %c0_92 = arith.constant 0 : index
    %355 = vector.load %arg3[%c174, %c0_92] : memref<256x32xf32, #tpu.memory_space<vmem>>, vector<2x32xf32>
    tpu.vector_store %arg3[%c174, %c0_92], %354 {strides = array<i32>} : memref<256x32xf32, #tpu.memory_space<vmem>>, vector<2x32xf32>,
    %356 = vector.extract_strided_slice %3 {offsets = [88, 0], sizes = [1, 32], strides = [1, 1]} : vector<128x32xf32> to vector<1x32xf32>
    %357 = vector.shape_cast %356 : vector<1x32xf32> to vector<1x32xf32>
    %358 = vector.broadcast %357 : vector<1x32xf32> to vector<2x32xf32>
    %c176 = arith.constant 176 : index
    %c0_93 = arith.constant 0 : index
    %359 = vector.load %arg3[%c176, %c0_93] : memref<256x32xf32, #tpu.memory_space<vmem>>, vector<2x32xf32>
    tpu.vector_store %arg3[%c176, %c0_93], %358 {strides = array<i32>} : memref<256x32xf32, #tpu.memory_space<vmem>>, vector<2x32xf32>,
    %360 = vector.extract_strided_slice %3 {offsets = [89, 0], sizes = [1, 32], strides = [1, 1]} : vector<128x32xf32> to vector<1x32xf32>
    %361 = vector.shape_cast %360 : vector<1x32xf32> to vector<1x32xf32>
    %362 = vector.broadcast %361 : vector<1x32xf32> to vector<2x32xf32>
    %c178 = arith.constant 178 : index
    %c0_94 = arith.constant 0 : index
    %363 = vector.load %arg3[%c178, %c0_94] : memref<256x32xf32, #tpu.memory_space<vmem>>, vector<2x32xf32>
    tpu.vector_store %arg3[%c178, %c0_94], %362 {strides = array<i32>} : memref<256x32xf32, #tpu.memory_space<vmem>>, vector<2x32xf32>,
    %364 = vector.extract_strided_slice %3 {offsets = [90, 0], sizes = [1, 32], strides = [1, 1]} : vector<128x32xf32> to vector<1x32xf32>
    %365 = vector.shape_cast %364 : vector<1x32xf32> to vector<1x32xf32>
    %366 = vector.broadcast %365 : vector<1x32xf32> to vector<2x32xf32>
    %c180 = arith.constant 180 : index
    %c0_95 = arith.constant 0 : index
    %367 = vector.load %arg3[%c180, %c0_95] : memref<256x32xf32, #tpu.memory_space<vmem>>, vector<2x32xf32>
    tpu.vector_store %arg3[%c180, %c0_95], %366 {strides = array<i32>} : memref<256x32xf32, #tpu.memory_space<vmem>>, vector<2x32xf32>,
    %368 = vector.extract_strided_slice %3 {offsets = [91, 0], sizes = [1, 32], strides = [1, 1]} : vector<128x32xf32> to vector<1x32xf32>
    %369 = vector.shape_cast %368 : vector<1x32xf32> to vector<1x32xf32>
    %370 = vector.broadcast %369 : vector<1x32xf32> to vector<2x32xf32>
    %c182 = arith.constant 182 : index
    %c0_96 = arith.constant 0 : index
    %371 = vector.load %arg3[%c182, %c0_96] : memref<256x32xf32, #tpu.memory_space<vmem>>, vector<2x32xf32>
    tpu.vector_store %arg3[%c182, %c0_96], %370 {strides = array<i32>} : memref<256x32xf32, #tpu.memory_space<vmem>>, vector<2x32xf32>,
    %372 = vector.extract_strided_slice %3 {offsets = [92, 0], sizes = [1, 32], strides = [1, 1]} : vector<128x32xf32> to vector<1x32xf32>
    %373 = vector.shape_cast %372 : vector<1x32xf32> to vector<1x32xf32>
    %374 = vector.broadcast %373 : vector<1x32xf32> to vector<2x32xf32>
    %c184 = arith.constant 184 : index
    %c0_97 = arith.constant 0 : index
    %375 = vector.load %arg3[%c184, %c0_97] : memref<256x32xf32, #tpu.memory_space<vmem>>, vector<2x32xf32>
    tpu.vector_store %arg3[%c184, %c0_97], %374 {strides = array<i32>} : memref<256x32xf32, #tpu.memory_space<vmem>>, vector<2x32xf32>,
    %376 = vector.extract_strided_slice %3 {offsets = [93, 0], sizes = [1, 32], strides = [1, 1]} : vector<128x32xf32> to vector<1x32xf32>
    %377 = vector.shape_cast %376 : vector<1x32xf32> to vector<1x32xf32>
    %378 = vector.broadcast %377 : vector<1x32xf32> to vector<2x32xf32>
    %c186 = arith.constant 186 : index
    %c0_98 = arith.constant 0 : index
    %379 = vector.load %arg3[%c186, %c0_98] : memref<256x32xf32, #tpu.memory_space<vmem>>, vector<2x32xf32>
    tpu.vector_store %arg3[%c186, %c0_98], %378 {strides = array<i32>} : memref<256x32xf32, #tpu.memory_space<vmem>>, vector<2x32xf32>,
    %380 = vector.extract_strided_slice %3 {offsets = [94, 0], sizes = [1, 32], strides = [1, 1]} : vector<128x32xf32> to vector<1x32xf32>
    %381 = vector.shape_cast %380 : vector<1x32xf32> to vector<1x32xf32>
    %382 = vector.broadcast %381 : vector<1x32xf32> to vector<2x32xf32>
    %c188 = arith.constant 188 : index
    %c0_99 = arith.constant 0 : index
    %383 = vector.load %arg3[%c188, %c0_99] : memref<256x32xf32, #tpu.memory_space<vmem>>, vector<2x32xf32>
    tpu.vector_store %arg3[%c188, %c0_99], %382 {strides = array<i32>} : memref<256x32xf32, #tpu.memory_space<vmem>>, vector<2x32xf32>,
    %384 = vector.extract_strided_slice %3 {offsets = [95, 0], sizes = [1, 32], strides = [1, 1]} : vector<128x32xf32> to vector<1x32xf32>
    %385 = vector.shape_cast %384 : vector<1x32xf32> to vector<1x32xf32>
    %386 = vector.broadcast %385 : vector<1x32xf32> to vector<2x32xf32>
    %c190 = arith.constant 190 : index
    %c0_100 = arith.constant 0 : index
    %387 = vector.load %arg3[%c190, %c0_100] : memref<256x32xf32, #tpu.memory_space<vmem>>, vector<2x32xf32>
    tpu.vector_store %arg3[%c190, %c0_100], %386 {strides = array<i32>} : memref<256x32xf32, #tpu.memory_space<vmem>>, vector<2x32xf32>,
    %388 = vector.extract_strided_slice %3 {offsets = [96, 0], sizes = [1, 32], strides = [1, 1]} : vector<128x32xf32> to vector<1x32xf32>
    %389 = vector.shape_cast %388 : vector<1x32xf32> to vector<1x32xf32>
    %390 = vector.broadcast %389 : vector<1x32xf32> to vector<2x32xf32>
    %c192 = arith.constant 192 : index
    %c0_101 = arith.constant 0 : index
    %391 = vector.load %arg3[%c192, %c0_101] : memref<256x32xf32, #tpu.memory_space<vmem>>, vector<2x32xf32>
    tpu.vector_store %arg3[%c192, %c0_101], %390 {strides = array<i32>} : memref<256x32xf32, #tpu.memory_space<vmem>>, vector<2x32xf32>,
    %392 = vector.extract_strided_slice %3 {offsets = [97, 0], sizes = [1, 32], strides = [1, 1]} : vector<128x32xf32> to vector<1x32xf32>
    %393 = vector.shape_cast %392 : vector<1x32xf32> to vector<1x32xf32>
    %394 = vector.broadcast %393 : vector<1x32xf32> to vector<2x32xf32>
    %c194 = arith.constant 194 : index
    %c0_102 = arith.constant 0 : index
    %395 = vector.load %arg3[%c194, %c0_102] : memref<256x32xf32, #tpu.memory_space<vmem>>, vector<2x32xf32>
    tpu.vector_store %arg3[%c194, %c0_102], %394 {strides = array<i32>} : memref<256x32xf32, #tpu.memory_space<vmem>>, vector<2x32xf32>,
    %396 = vector.extract_strided_slice %3 {offsets = [98, 0], sizes = [1, 32], strides = [1, 1]} : vector<128x32xf32> to vector<1x32xf32>
    %397 = vector.shape_cast %396 : vector<1x32xf32> to vector<1x32xf32>
    %398 = vector.broadcast %397 : vector<1x32xf32> to vector<2x32xf32>
    %c196 = arith.constant 196 : index
    %c0_103 = arith.constant 0 : index
    %399 = vector.load %arg3[%c196, %c0_103] : memref<256x32xf32, #tpu.memory_space<vmem>>, vector<2x32xf32>
    tpu.vector_store %arg3[%c196, %c0_103], %398 {strides = array<i32>} : memref<256x32xf32, #tpu.memory_space<vmem>>, vector<2x32xf32>,
    %400 = vector.extract_strided_slice %3 {offsets = [99, 0], sizes = [1, 32], strides = [1, 1]} : vector<128x32xf32> to vector<1x32xf32>
    %401 = vector.shape_cast %400 : vector<1x32xf32> to vector<1x32xf32>
    %402 = vector.broadcast %401 : vector<1x32xf32> to vector<2x32xf32>
    %c198 = arith.constant 198 : index
    %c0_104 = arith.constant 0 : index
    %403 = vector.load %arg3[%c198, %c0_104] : memref<256x32xf32, #tpu.memory_space<vmem>>, vector<2x32xf32>
    tpu.vector_store %arg3[%c198, %c0_104], %402 {strides = array<i32>} : memref<256x32xf32, #tpu.memory_space<vmem>>, vector<2x32xf32>,
    %404 = vector.extract_strided_slice %3 {offsets = [100, 0], sizes = [1, 32], strides = [1, 1]} : vector<128x32xf32> to vector<1x32xf32>
    %405 = vector.shape_cast %404 : vector<1x32xf32> to vector<1x32xf32>
    %406 = vector.broadcast %405 : vector<1x32xf32> to vector<2x32xf32>
    %c200 = arith.constant 200 : index
    %c0_105 = arith.constant 0 : index
    %407 = vector.load %arg3[%c200, %c0_105] : memref<256x32xf32, #tpu.memory_space<vmem>>, vector<2x32xf32>
    tpu.vector_store %arg3[%c200, %c0_105], %406 {strides = array<i32>} : memref<256x32xf32, #tpu.memory_space<vmem>>, vector<2x32xf32>,
    %408 = vector.extract_strided_slice %3 {offsets = [101, 0], sizes = [1, 32], strides = [1, 1]} : vector<128x32xf32> to vector<1x32xf32>
    %409 = vector.shape_cast %408 : vector<1x32xf32> to vector<1x32xf32>
    %410 = vector.broadcast %409 : vector<1x32xf32> to vector<2x32xf32>
    %c202 = arith.constant 202 : index
    %c0_106 = arith.constant 0 : index
    %411 = vector.load %arg3[%c202, %c0_106] : memref<256x32xf32, #tpu.memory_space<vmem>>, vector<2x32xf32>
    tpu.vector_store %arg3[%c202, %c0_106], %410 {strides = array<i32>} : memref<256x32xf32, #tpu.memory_space<vmem>>, vector<2x32xf32>,
    %412 = vector.extract_strided_slice %3 {offsets = [102, 0], sizes = [1, 32], strides = [1, 1]} : vector<128x32xf32> to vector<1x32xf32>
    %413 = vector.shape_cast %412 : vector<1x32xf32> to vector<1x32xf32>
    %414 = vector.broadcast %413 : vector<1x32xf32> to vector<2x32xf32>
    %c204 = arith.constant 204 : index
    %c0_107 = arith.constant 0 : index
    %415 = vector.load %arg3[%c204, %c0_107] : memref<256x32xf32, #tpu.memory_space<vmem>>, vector<2x32xf32>
    tpu.vector_store %arg3[%c204, %c0_107], %414 {strides = array<i32>} : memref<256x32xf32, #tpu.memory_space<vmem>>, vector<2x32xf32>,
    %416 = vector.extract_strided_slice %3 {offsets = [103, 0], sizes = [1, 32], strides = [1, 1]} : vector<128x32xf32> to vector<1x32xf32>
    %417 = vector.shape_cast %416 : vector<1x32xf32> to vector<1x32xf32>
    %418 = vector.broadcast %417 : vector<1x32xf32> to vector<2x32xf32>
    %c206 = arith.constant 206 : index
    %c0_108 = arith.constant 0 : index
    %419 = vector.load %arg3[%c206, %c0_108] : memref<256x32xf32, #tpu.memory_space<vmem>>, vector<2x32xf32>
    tpu.vector_store %arg3[%c206, %c0_108], %418 {strides = array<i32>} : memref<256x32xf32, #tpu.memory_space<vmem>>, vector<2x32xf32>,
    %420 = vector.extract_strided_slice %3 {offsets = [104, 0], sizes = [1, 32], strides = [1, 1]} : vector<128x32xf32> to vector<1x32xf32>
    %421 = vector.shape_cast %420 : vector<1x32xf32> to vector<1x32xf32>
    %422 = vector.broadcast %421 : vector<1x32xf32> to vector<2x32xf32>
    %c208 = arith.constant 208 : index
    %c0_109 = arith.constant 0 : index
    %423 = vector.load %arg3[%c208, %c0_109] : memref<256x32xf32, #tpu.memory_space<vmem>>, vector<2x32xf32>
    tpu.vector_store %arg3[%c208, %c0_109], %422 {strides = array<i32>} : memref<256x32xf32, #tpu.memory_space<vmem>>, vector<2x32xf32>,
    %424 = vector.extract_strided_slice %3 {offsets = [105, 0], sizes = [1, 32], strides = [1, 1]} : vector<128x32xf32> to vector<1x32xf32>
    %425 = vector.shape_cast %424 : vector<1x32xf32> to vector<1x32xf32>
    %426 = vector.broadcast %425 : vector<1x32xf32> to vector<2x32xf32>
    %c210 = arith.constant 210 : index
    %c0_110 = arith.constant 0 : index
    %427 = vector.load %arg3[%c210, %c0_110] : memref<256x32xf32, #tpu.memory_space<vmem>>, vector<2x32xf32>
    tpu.vector_store %arg3[%c210, %c0_110], %426 {strides = array<i32>} : memref<256x32xf32, #tpu.memory_space<vmem>>, vector<2x32xf32>,
    %428 = vector.extract_strided_slice %3 {offsets = [106, 0], sizes = [1, 32], strides = [1, 1]} : vector<128x32xf32> to vector<1x32xf32>
    %429 = vector.shape_cast %428 : vector<1x32xf32> to vector<1x32xf32>
    %430 = vector.broadcast %429 : vector<1x32xf32> to vector<2x32xf32>
    %c212 = arith.constant 212 : index
    %c0_111 = arith.constant 0 : index
    %431 = vector.load %arg3[%c212, %c0_111] : memref<256x32xf32, #tpu.memory_space<vmem>>, vector<2x32xf32>
    tpu.vector_store %arg3[%c212, %c0_111], %430 {strides = array<i32>} : memref<256x32xf32, #tpu.memory_space<vmem>>, vector<2x32xf32>,
    %432 = vector.extract_strided_slice %3 {offsets = [107, 0], sizes = [1, 32], strides = [1, 1]} : vector<128x32xf32> to vector<1x32xf32>
    %433 = vector.shape_cast %432 : vector<1x32xf32> to vector<1x32xf32>
    %434 = vector.broadcast %433 : vector<1x32xf32> to vector<2x32xf32>
    %c214 = arith.constant 214 : index
    %c0_112 = arith.constant 0 : index
    %435 = vector.load %arg3[%c214, %c0_112] : memref<256x32xf32, #tpu.memory_space<vmem>>, vector<2x32xf32>
    tpu.vector_store %arg3[%c214, %c0_112], %434 {strides = array<i32>} : memref<256x32xf32, #tpu.memory_space<vmem>>, vector<2x32xf32>,
    %436 = vector.extract_strided_slice %3 {offsets = [108, 0], sizes = [1, 32], strides = [1, 1]} : vector<128x32xf32> to vector<1x32xf32>
    %437 = vector.shape_cast %436 : vector<1x32xf32> to vector<1x32xf32>
    %438 = vector.broadcast %437 : vector<1x32xf32> to vector<2x32xf32>
    %c216 = arith.constant 216 : index
    %c0_113 = arith.constant 0 : index
    %439 = vector.load %arg3[%c216, %c0_113] : memref<256x32xf32, #tpu.memory_space<vmem>>, vector<2x32xf32>
    tpu.vector_store %arg3[%c216, %c0_113], %438 {strides = array<i32>} : memref<256x32xf32, #tpu.memory_space<vmem>>, vector<2x32xf32>,
    %440 = vector.extract_strided_slice %3 {offsets = [109, 0], sizes = [1, 32], strides = [1, 1]} : vector<128x32xf32> to vector<1x32xf32>
    %441 = vector.shape_cast %440 : vector<1x32xf32> to vector<1x32xf32>
    %442 = vector.broadcast %441 : vector<1x32xf32> to vector<2x32xf32>
    %c218 = arith.constant 218 : index
    %c0_114 = arith.constant 0 : index
    %443 = vector.load %arg3[%c218, %c0_114] : memref<256x32xf32, #tpu.memory_space<vmem>>, vector<2x32xf32>
    tpu.vector_store %arg3[%c218, %c0_114], %442 {strides = array<i32>} : memref<256x32xf32, #tpu.memory_space<vmem>>, vector<2x32xf32>,
    %444 = vector.extract_strided_slice %3 {offsets = [110, 0], sizes = [1, 32], strides = [1, 1]} : vector<128x32xf32> to vector<1x32xf32>
    %445 = vector.shape_cast %444 : vector<1x32xf32> to vector<1x32xf32>
    %446 = vector.broadcast %445 : vector<1x32xf32> to vector<2x32xf32>
    %c220 = arith.constant 220 : index
    %c0_115 = arith.constant 0 : index
    %447 = vector.load %arg3[%c220, %c0_115] : memref<256x32xf32, #tpu.memory_space<vmem>>, vector<2x32xf32>
    tpu.vector_store %arg3[%c220, %c0_115], %446 {strides = array<i32>} : memref<256x32xf32, #tpu.memory_space<vmem>>, vector<2x32xf32>,
    %448 = vector.extract_strided_slice %3 {offsets = [111, 0], sizes = [1, 32], strides = [1, 1]} : vector<128x32xf32> to vector<1x32xf32>
    %449 = vector.shape_cast %448 : vector<1x32xf32> to vector<1x32xf32>
    %450 = vector.broadcast %449 : vector<1x32xf32> to vector<2x32xf32>
    %c222 = arith.constant 222 : index
    %c0_116 = arith.constant 0 : index
    %451 = vector.load %arg3[%c222, %c0_116] : memref<256x32xf32, #tpu.memory_space<vmem>>, vector<2x32xf32>
    tpu.vector_store %arg3[%c222, %c0_116], %450 {strides = array<i32>} : memref<256x32xf32, #tpu.memory_space<vmem>>, vector<2x32xf32>,
    %452 = vector.extract_strided_slice %3 {offsets = [112, 0], sizes = [1, 32], strides = [1, 1]} : vector<128x32xf32> to vector<1x32xf32>
    %453 = vector.shape_cast %452 : vector<1x32xf32> to vector<1x32xf32>
    %454 = vector.broadcast %453 : vector<1x32xf32> to vector<2x32xf32>
    %c224 = arith.constant 224 : index
    %c0_117 = arith.constant 0 : index
    %455 = vector.load %arg3[%c224, %c0_117] : memref<256x32xf32, #tpu.memory_space<vmem>>, vector<2x32xf32>
    tpu.vector_store %arg3[%c224, %c0_117], %454 {strides = array<i32>} : memref<256x32xf32, #tpu.memory_space<vmem>>, vector<2x32xf32>,
    %456 = vector.extract_strided_slice %3 {offsets = [113, 0], sizes = [1, 32], strides = [1, 1]} : vector<128x32xf32> to vector<1x32xf32>
    %457 = vector.shape_cast %456 : vector<1x32xf32> to vector<1x32xf32>
    %458 = vector.broadcast %457 : vector<1x32xf32> to vector<2x32xf32>
    %c226 = arith.constant 226 : index
    %c0_118 = arith.constant 0 : index
    %459 = vector.load %arg3[%c226, %c0_118] : memref<256x32xf32, #tpu.memory_space<vmem>>, vector<2x32xf32>
    tpu.vector_store %arg3[%c226, %c0_118], %458 {strides = array<i32>} : memref<256x32xf32, #tpu.memory_space<vmem>>, vector<2x32xf32>,
    %460 = vector.extract_strided_slice %3 {offsets = [114, 0], sizes = [1, 32], strides = [1, 1]} : vector<128x32xf32> to vector<1x32xf32>
    %461 = vector.shape_cast %460 : vector<1x32xf32> to vector<1x32xf32>
    %462 = vector.broadcast %461 : vector<1x32xf32> to vector<2x32xf32>
    %c228 = arith.constant 228 : index
    %c0_119 = arith.constant 0 : index
    %463 = vector.load %arg3[%c228, %c0_119] : memref<256x32xf32, #tpu.memory_space<vmem>>, vector<2x32xf32>
    tpu.vector_store %arg3[%c228, %c0_119], %462 {strides = array<i32>} : memref<256x32xf32, #tpu.memory_space<vmem>>, vector<2x32xf32>,
    %464 = vector.extract_strided_slice %3 {offsets = [115, 0], sizes = [1, 32], strides = [1, 1]} : vector<128x32xf32> to vector<1x32xf32>
    %465 = vector.shape_cast %464 : vector<1x32xf32> to vector<1x32xf32>
    %466 = vector.broadcast %465 : vector<1x32xf32> to vector<2x32xf32>
    %c230 = arith.constant 230 : index
    %c0_120 = arith.constant 0 : index
    %467 = vector.load %arg3[%c230, %c0_120] : memref<256x32xf32, #tpu.memory_space<vmem>>, vector<2x32xf32>
    tpu.vector_store %arg3[%c230, %c0_120], %466 {strides = array<i32>} : memref<256x32xf32, #tpu.memory_space<vmem>>, vector<2x32xf32>,
    %468 = vector.extract_strided_slice %3 {offsets = [116, 0], sizes = [1, 32], strides = [1, 1]} : vector<128x32xf32> to vector<1x32xf32>
    %469 = vector.shape_cast %468 : vector<1x32xf32> to vector<1x32xf32>
    %470 = vector.broadcast %469 : vector<1x32xf32> to vector<2x32xf32>
    %c232 = arith.constant 232 : index
    %c0_121 = arith.constant 0 : index
    %471 = vector.load %arg3[%c232, %c0_121] : memref<256x32xf32, #tpu.memory_space<vmem>>, vector<2x32xf32>
    tpu.vector_store %arg3[%c232, %c0_121], %470 {strides = array<i32>} : memref<256x32xf32, #tpu.memory_space<vmem>>, vector<2x32xf32>,
    %472 = vector.extract_strided_slice %3 {offsets = [117, 0], sizes = [1, 32], strides = [1, 1]} : vector<128x32xf32> to vector<1x32xf32>
    %473 = vector.shape_cast %472 : vector<1x32xf32> to vector<1x32xf32>
    %474 = vector.broadcast %473 : vector<1x32xf32> to vector<2x32xf32>
    %c234 = arith.constant 234 : index
    %c0_122 = arith.constant 0 : index
    %475 = vector.load %arg3[%c234, %c0_122] : memref<256x32xf32, #tpu.memory_space<vmem>>, vector<2x32xf32>
    tpu.vector_store %arg3[%c234, %c0_122], %474 {strides = array<i32>} : memref<256x32xf32, #tpu.memory_space<vmem>>, vector<2x32xf32>,
    %476 = vector.extract_strided_slice %3 {offsets = [118, 0], sizes = [1, 32], strides = [1, 1]} : vector<128x32xf32> to vector<1x32xf32>
    %477 = vector.shape_cast %476 : vector<1x32xf32> to vector<1x32xf32>
    %478 = vector.broadcast %477 : vector<1x32xf32> to vector<2x32xf32>
    %c236 = arith.constant 236 : index
    %c0_123 = arith.constant 0 : index
    %479 = vector.load %arg3[%c236, %c0_123] : memref<256x32xf32, #tpu.memory_space<vmem>>, vector<2x32xf32>
    tpu.vector_store %arg3[%c236, %c0_123], %478 {strides = array<i32>} : memref<256x32xf32, #tpu.memory_space<vmem>>, vector<2x32xf32>,
    %480 = vector.extract_strided_slice %3 {offsets = [119, 0], sizes = [1, 32], strides = [1, 1]} : vector<128x32xf32> to vector<1x32xf32>
    %481 = vector.shape_cast %480 : vector<1x32xf32> to vector<1x32xf32>
    %482 = vector.broadcast %481 : vector<1x32xf32> to vector<2x32xf32>
    %c238 = arith.constant 238 : index
    %c0_124 = arith.constant 0 : index
    %483 = vector.load %arg3[%c238, %c0_124] : memref<256x32xf32, #tpu.memory_space<vmem>>, vector<2x32xf32>
    tpu.vector_store %arg3[%c238, %c0_124], %482 {strides = array<i32>} : memref<256x32xf32, #tpu.memory_space<vmem>>, vector<2x32xf32>,
    %484 = vector.extract_strided_slice %3 {offsets = [120, 0], sizes = [1, 32], strides = [1, 1]} : vector<128x32xf32> to vector<1x32xf32>
    %485 = vector.shape_cast %484 : vector<1x32xf32> to vector<1x32xf32>
    %486 = vector.broadcast %485 : vector<1x32xf32> to vector<2x32xf32>
    %c240 = arith.constant 240 : index
    %c0_125 = arith.constant 0 : index
    %487 = vector.load %arg3[%c240, %c0_125] : memref<256x32xf32, #tpu.memory_space<vmem>>, vector<2x32xf32>
    tpu.vector_store %arg3[%c240, %c0_125], %486 {strides = array<i32>} : memref<256x32xf32, #tpu.memory_space<vmem>>, vector<2x32xf32>,
    %488 = vector.extract_strided_slice %3 {offsets = [121, 0], sizes = [1, 32], strides = [1, 1]} : vector<128x32xf32> to vector<1x32xf32>
    %489 = vector.shape_cast %488 : vector<1x32xf32> to vector<1x32xf32>
    %490 = vector.broadcast %489 : vector<1x32xf32> to vector<2x32xf32>
    %c242 = arith.constant 242 : index
    %c0_126 = arith.constant 0 : index
    %491 = vector.load %arg3[%c242, %c0_126] : memref<256x32xf32, #tpu.memory_space<vmem>>, vector<2x32xf32>
    tpu.vector_store %arg3[%c242, %c0_126], %490 {strides = array<i32>} : memref<256x32xf32, #tpu.memory_space<vmem>>, vector<2x32xf32>,
    %492 = vector.extract_strided_slice %3 {offsets = [122, 0], sizes = [1, 32], strides = [1, 1]} : vector<128x32xf32> to vector<1x32xf32>
    %493 = vector.shape_cast %492 : vector<1x32xf32> to vector<1x32xf32>
    %494 = vector.broadcast %493 : vector<1x32xf32> to vector<2x32xf32>
    %c244 = arith.constant 244 : index
    %c0_127 = arith.constant 0 : index
    %495 = vector.load %arg3[%c244, %c0_127] : memref<256x32xf32, #tpu.memory_space<vmem>>, vector<2x32xf32>
    tpu.vector_store %arg3[%c244, %c0_127], %494 {strides = array<i32>} : memref<256x32xf32, #tpu.memory_space<vmem>>, vector<2x32xf32>,
    %496 = vector.extract_strided_slice %3 {offsets = [123, 0], sizes = [1, 32], strides = [1, 1]} : vector<128x32xf32> to vector<1x32xf32>
    %497 = vector.shape_cast %496 : vector<1x32xf32> to vector<1x32xf32>
    %498 = vector.broadcast %497 : vector<1x32xf32> to vector<2x32xf32>
    %c246 = arith.constant 246 : index
    %c0_128 = arith.constant 0 : index
    %499 = vector.load %arg3[%c246, %c0_128] : memref<256x32xf32, #tpu.memory_space<vmem>>, vector<2x32xf32>
    tpu.vector_store %arg3[%c246, %c0_128], %498 {strides = array<i32>} : memref<256x32xf32, #tpu.memory_space<vmem>>, vector<2x32xf32>,
    %500 = vector.extract_strided_slice %3 {offsets = [124, 0], sizes = [1, 32], strides = [1, 1]} : vector<128x32xf32> to vector<1x32xf32>
    %501 = vector.shape_cast %500 : vector<1x32xf32> to vector<1x32xf32>
    %502 = vector.broadcast %501 : vector<1x32xf32> to vector<2x32xf32>
    %c248 = arith.constant 248 : index
    %c0_129 = arith.constant 0 : index
    %503 = vector.load %arg3[%c248, %c0_129] : memref<256x32xf32, #tpu.memory_space<vmem>>, vector<2x32xf32>
    tpu.vector_store %arg3[%c248, %c0_129], %502 {strides = array<i32>} : memref<256x32xf32, #tpu.memory_space<vmem>>, vector<2x32xf32>,
    %504 = vector.extract_strided_slice %3 {offsets = [125, 0], sizes = [1, 32], strides = [1, 1]} : vector<128x32xf32> to vector<1x32xf32>
    %505 = vector.shape_cast %504 : vector<1x32xf32> to vector<1x32xf32>
    %506 = vector.broadcast %505 : vector<1x32xf32> to vector<2x32xf32>
    %c250 = arith.constant 250 : index
    %c0_130 = arith.constant 0 : index
    %507 = vector.load %arg3[%c250, %c0_130] : memref<256x32xf32, #tpu.memory_space<vmem>>, vector<2x32xf32>
    tpu.vector_store %arg3[%c250, %c0_130], %506 {strides = array<i32>} : memref<256x32xf32, #tpu.memory_space<vmem>>, vector<2x32xf32>,
    %508 = vector.extract_strided_slice %3 {offsets = [126, 0], sizes = [1, 32], strides = [1, 1]} : vector<128x32xf32> to vector<1x32xf32>
    %509 = vector.shape_cast %508 : vector<1x32xf32> to vector<1x32xf32>
    %510 = vector.broadcast %509 : vector<1x32xf32> to vector<2x32xf32>
    %c252 = arith.constant 252 : index
    %c0_131 = arith.constant 0 : index
    %511 = vector.load %arg3[%c252, %c0_131] : memref<256x32xf32, #tpu.memory_space<vmem>>, vector<2x32xf32>
    tpu.vector_store %arg3[%c252, %c0_131], %510 {strides = array<i32>} : memref<256x32xf32, #tpu.memory_space<vmem>>, vector<2x32xf32>,
    %512 = vector.extract_strided_slice %3 {offsets = [127, 0], sizes = [1, 32], strides = [1, 1]} : vector<128x32xf32> to vector<1x32xf32>
    %513 = vector.shape_cast %512 : vector<1x32xf32> to vector<1x32xf32>
    %514 = vector.broadcast %513 : vector<1x32xf32> to vector<2x32xf32>
    %c254 = arith.constant 254 : index
    %c0_132 = arith.constant 0 : index
    %515 = vector.load %arg3[%c254, %c0_132] : memref<256x32xf32, #tpu.memory_space<vmem>>, vector<2x32xf32>
    tpu.vector_store %arg3[%c254, %c0_132], %514 {strides = array<i32>} : memref<256x32xf32, #tpu.memory_space<vmem>>, vector<2x32xf32>,
    return
  }
  func.func @transform_0(%arg0: i32) -> (i32, i32) {
    %c0_i32 = arith.constant 0 : i32
    %c0_i32_0 = arith.constant 0 : i32
    return %arg0, %c0_i32 : i32, i32
  }
  func.func @transform_1(%arg0: i32) -> (i32, i32, i32) {
    %c0_i32 = arith.constant 0 : i32
    %c0_i32_0 = arith.constant 0 : i32
    %c0_i32_1 = arith.constant 0 : i32
    %c0_i32_2 = arith.constant 0 : i32
    return %c0_i32, %c0_i32_0, %c0_i32_1 : i32, i32, i32
  }
  func.func @transform_2(%arg0: i32) -> (i32, i32) {
    %c0_i32 = arith.constant 0 : i32
    %c0_i32_0 = arith.constant 0 : i32
    return %arg0, %c0_i32 : i32, i32
  }
}

</mosaic_0001>

<bundles_post_ra>
// kernel: tpu_custom_call.1
= control target key start
LH: loop header
LB: loop body
LE: loop exit
PB: predicated region body
PF: predicated region fallthrough
CT: control target
= control target key end

     0   :  { %vm29_vm0 = vcmask 130048   ;;  %vm1186_vm1 = vcmask 254976   ;;  %s3213_s1 = inlined_call_operand.vmem [shape: f32[1,16,32], index: 1, kind: input, shape index: {}]   ;;  %s3214_s0 = inlined_call_operand.vmem [shape: f32[128,16], index: 0, kind: input, shape index: {}]   ;;  %s3215_s2 = inlined_call_operand.vmem [shape: f32[256,32], index: 2, kind: output, shape index: {}]  }
   0x1   :  { %v11_v0 = vld [vmem:[%s3213_s1] sm:$0xff]  ;;  %v12_v1 = vld [vmem:[%s3213_s1 + $0x8] sm:$0xff]  ;;  %v15_v7 = vld [vmem:[%s3214_s0 + $0x10] sm:$0xff] }
   0x2   :  { %v13_v2 = vld [vmem:[%s3214_s0] sm:$0xff]  ;;  %v79_v3 = vand.u32 4294901760, %v11_v0  ;;  %v82_v4 = vand.u32 4294901760, %v12_v1  ;;  %v14_v6 = vld [vmem:[%s3214_s0 + $0x8] sm:$0xff]  ;;  %v16_v8 = vld [vmem:[%s3214_s0 + $0x18] sm:$0xff]  ;;  %v37_v11 = vsel %vm29_vm0, %v15_v7, 0 }
   0x3   :  { %v31_v5 = vsel %vm29_vm0, %v13_v2, 0  ;;  %v34_v10 = vsel %vm29_vm0, %v14_v6, 0  ;;  %v40_v12 = vsel %vm29_vm0, %v16_v8, 0  ;;  %v17_v13 = vld [vmem:[%s3214_s0 + $0x20] sm:$0xff]  ;;  %v2253_v16 = vand.u32 4294901760, %v37_v11  ;;  %v18_v18 = vld [vmem:[%s3214_s0 + $0x28] sm:$0xff] }
   0x4   :  { %v2241_v9 = vand.u32 4294901760, %v31_v5  ;;  %v2249_v14 = vpack.c.bf16 %v82_v4, %v79_v3  ;;  %v2251_v15 = vand.u32 4294901760, %v34_v10  ;;  %v2255_v17 = vsub.f32 %v11_v0, %v79_v3  ;;  %v19_v39 = vld [vmem:[%s3214_s0 + $0x30] sm:$0xff]  ;;  %v20_v48 = vld [vmem:[%s3214_s0 + $0x38] sm:$0xff]  ;;  %v21_v49 = vld [vmem:[%s3214_s0 + $0x40] sm:$0xff] }
   0x5   :  { %v2263_v20 = vsub.f32 %v12_v1, %v82_v4  ;;  %v2265_v21 = vand.u32 4294901760, %v40_v12  ;;  %v43_v22 = vsel %vm29_vm0, %v17_v13, 0  ;;  %v2274_v24 = vsub.f32 %v37_v11, %v2253_v16  ;;  %v22_v50 = vld [vmem:[%s3214_s0 + $0x48] sm:$0xff]  ;;  %v23_v59 = vld [vmem:[%s3214_s0 + $0x50] sm:$0xff]  ;;  %v24_v60 = vld [vmem:[%s3214_s0 + $0x58] sm:$0xff] }
   0x6   :  { %v2261_v19 = vsub.f32 %v31_v5, %v2241_v9  ;;  %2116 = vmatprep.subr.bf16.mxu0 %v2249_v14  ;;  %2104 = vmatprep.subr.bf16.mxu1 %v2249_v14  ;;  %v2271_v23 = vsub.f32 %v34_v10, %v2251_v15  ;;  %v308_v25 = vand.u32 4294901760, %v2255_v17  ;;  %v2277_v26 = vand.u32 4294901760, %v43_v22  ;;  %v25_v61 = vld [vmem:[%s3214_s0 + $0x60] sm:$0xff] }
   0x7   :  { %2118 = vmatpush3.bf16.msra.mxu0 %v2249_v14  ;;  %2106 = vmatpush3.bf16.msra.mxu1 %v2249_v14  ;;  %v315_v28 = vand.u32 4294901760, %v2263_v20  ;;  %v2284_v29 = vsub.f32 %v40_v12, %v2265_v21  ;;  %v46_v30 = vsel %vm29_vm0, %v18_v18, 0  ;;  %v167_v32 = vand.u32 4294901760, %v2274_v24 }
   0x8   :  { %v147_v27 = vand.u32 4294901760, %v2261_v19  ;;  %v157_v31 = vand.u32 4294901760, %v2271_v23  ;;  %v309_v33 = vsub.f32 %v2255_v17, %v308_v25  ;;  %v2291_v34 = vsub.f32 %v43_v22, %v2277_v26 }
   0x9   :  { %v316_v36 = vsub.f32 %v2263_v20, %v315_v28  ;;  %v177_v37 = vand.u32 4294901760, %v2284_v29  ;;  %v2119_v38 = vpack.c.bf16 %v315_v28, %v308_v25  ;;  %v168_v42 = vsub.f32 %v2274_v24, %v167_v32 }
   0xa   :  { %2023 = vmatprep.mubr.f32.mxu0 %v147_v27  ;;  %v148_v35 = vsub.f32 %v2261_v19, %v147_v27  ;;  %v158_v40 = vsub.f32 %v2271_v23, %v157_v31  ;;  %v310_v41 = vand.u32 4294901760, %v309_v33  ;;  %v187_v43 = vand.u32 4294901760, %v2291_v34 }
   0xb   :  { %2024 = vmatmul.mubr.f32.vlgmr.msra.gmra.mrb[0].mxu0 %v157_v31  ;;  %v317_v45 = vand.u32 4294901760, %v316_v36  ;;  %2120 = vmatprep.subr.bf16.mxu0 %v2119_v38  ;;  %v178_v46 = vsub.f32 %v2284_v29, %v177_v37  ;;  %v2303_v47 = vand.u32 4294901760, %v46_v30  ;;  %v169_v52 = vand.u32 4294901760, %v168_v42 }
   0xc   :  { %v149_v44 = vand.u32 4294901760, %v148_v35  ;;  %2026 = vmatprep.mubr.f32.mxu0 %v167_v32  ;;  %v159_v51 = vand.u32 4294901760, %v158_v40  ;;  %2122 = vmatpush3.bf16.msra.mxu0 %v2119_v38  ;;  %v188_v53 = vsub.f32 %v2291_v34, %v187_v43  ;;  %v49_v54 = vsel %vm29_vm0, %v19_v39, 0  ;;  %v27_v40 = vld [vmem:[%s3214_s0 + $0x70] sm:$0xff] }
   0xd   :  { %v2107_v55 = vpack.c.bf16 %v317_v45, %v310_v41  ;;  %v179_v56 = vand.u32 4294901760, %v178_v46  ;;  %v2317_v57 = vsub.f32 %v46_v30, %v2303_v47  ;;  %v2319_v58 = vand.u32 4294901760, %v49_v54  ;;  %2124 = vmatprep.subr.bf16.mxu0 %v2249_v14  ;;  %v26_v30 = vld [vmem:[%s3214_s0 + $0x68] sm:$0xff] }
   0xe   :  { %1939 = vmatprep.mubr.f32.mxu1 %v149_v44  ;;  %v189_v62 = vand.u32 4294901760, %v188_v53  ;;  %v52_v63 = vsel %vm29_vm0, %v20_v48, 0  ;;  %v55_v0 = vsel %vm29_vm0, %v21_v49, 0  ;;  %v58_v1 = vsel %vm29_vm0, %v22_v50, 0  ;;  %v28_v50 = vld [vmem:[%s3214_s0 + $0x78] sm:$0xff] }
   0xf   :  { %1940 = vmatmul.mubr.f32.vlgmr.msra.gmra.mrb[0].mxu1 %v159_v51  ;;  %2027 = vmatmul.mubr.f32.gmra.mrb[2].mxu0 %v177_v37  ;;  %v197_v2 = vand.u32 4294901760, %v2317_v57  ;;  %v2336_v3 = vsub.f32 %v49_v54, %v2319_v58  ;;  %v2338_v4 = vand.u32 4294901760, %v52_v63  ;;  %v2340_v5 = vand.u32 4294901760, %v55_v0 }
  0x10   :  { %2108 = vmatprep.subr.bf16.mxu1 %v2107_v55  ;;  %1942 = vmatprep.mubr.f32.mxu1 %v169_v52  ;;  %v2342_v6 = vand.u32 4294901760, %v58_v1  ;;  %v61_v7 = vsel %vm29_vm0, %v23_v59, 0  ;;  %v64_v8 = vsel %vm29_vm0, %v24_v60, 0  ;;  %v67_v10 = vsel %vm29_vm0, %v25_v61, 0 }
  0x11   :  { %2110 = vmatpush3.bf16.msra.mxu1 %v2107_v55  ;;  %2029 = vmatprep.mubr.f32.mxu0 %v187_v43  ;;  %v207_v11 = vand.u32 4294901760, %v2336_v3  ;;  %v198_v12 = vsub.f32 %v2317_v57, %v197_v2  ;;  %v2350_v13 = vsub.f32 %v52_v63, %v2338_v4  ;;  %v2353_v18 = vsub.f32 %v55_v0, %v2340_v5 }
  0x12   :  { %v2356_v22 = vsub.f32 %v58_v1, %v2342_v6  ;;  %v2358_v25 = vand.u32 4294901760, %v61_v7  ;;  %v2360_v27 = vand.u32 4294901760, %v64_v8  ;;  %v2362_v28 = vand.u32 4294901760, %v67_v10 }
  0x13   :  { %1943 = vmatmul.mubr.f32.gmra.mrb[2].mxu1 %v179_v56  ;;  %2030 = vmatmul.mubr.f32.gmra.mrb[4].mxu0 %v197_v2  ;;  %v199_v31 = vand.u32 4294901760, %v198_v12  ;;  %v217_v32 = vand.u32 4294901760, %v2350_v13  ;;  %v208_v33 = vsub.f32 %v2336_v3, %v207_v11  ;;  %v227_v35 = vand.u32 4294901760, %v2353_v18 }
  0x14   :  { %1945 = vmatprep.mubr.f32.mxu1 %v189_v62  ;;  %2032 = vmatprep.mubr.f32.mxu0 %v207_v11  ;;  %v237_v36 = vand.u32 4294901760, %v2356_v22  ;;  %v2372_v37 = vsub.f32 %v61_v7, %v2358_v25  ;;  %v2375_v38 = vsub.f32 %v64_v8, %v2360_v27  ;;  %v2378_v39 = vsub.f32 %v67_v10, %v2362_v28 }
  0x15   :  { %v209_v41 = vand.u32 4294901760, %v208_v33  ;;  %v218_v42 = vsub.f32 %v2350_v13, %v217_v32  ;;  %v228_v43 = vsub.f32 %v2353_v18, %v227_v35  ;;  %v70_v44 = vsel %vm29_vm0, %v26_v30, 0 }
  0x16   :  { %v247_v45 = vand.u32 4294901760, %v2372_v37  ;;  %v238_v46 = vsub.f32 %v2356_v22, %v237_v36  ;;  %v257_v48 = vand.u32 4294901760, %v2375_v38  ;;  %v267_v49 = vand.u32 4294901760, %v2378_v39 }
  0x17   :  { %1946 = vmatmul.mubr.f32.gmra.mrb[4].mxu1 %v199_v31  ;;  %2033 = vmatmul.mubr.f32.gmra.mrb[6].mxu0 %v217_v32  ;;  %v219_v51 = vand.u32 4294901760, %v218_v42  ;;  %v229_v52 = vand.u32 4294901760, %v228_v43  ;;  %v2393_v53 = vand.u32 4294901760, %v70_v44  ;;  %v73_v54 = vsel %vm29_vm0, %v27_v40, 0 }
  0x18   :  { %1948 = vmatprep.mubr.f32.mxu1 %v209_v41  ;;  %2035 = vmatprep.mubr.f32.mxu0 %v227_v35  ;;  %v248_v55 = vsub.f32 %v2372_v37, %v247_v45  ;;  %v2400_v59 = vand.u32 4294901760, %v73_v54  ;;  %v76_v60 = vsel %vm29_vm0, %v28_v50, 0  ;;  %v2111_v61 = vpack.c.bf16 %v2263_v20, %v2255_v17 }
  0x19   :  { %v2398_v56 = vsub.f32 %v70_v44, %v2393_v53  ;;  %v239_v62 = vand.u32 4294901760, %v238_v46  ;;  %v258_v63 = vsub.f32 %v2375_v38, %v257_v48  ;;  %v2406_v0 = vand.u32 4294901760, %v76_v60 }
  0x1a   :  { %v249_v1 = vand.u32 4294901760, %v248_v55  ;;  %v268_v7 = vsub.f32 %v2378_v39, %v267_v49  ;;  %v2411_v8 = vsub.f32 %v73_v54, %v2400_v59  ;;  %2112 = vmatprep.subr.bf16.mxu1 %v2111_v61 }
  0x1b   :  { %1949 = vmatmul.mubr.f32.gmra.mrb[6].mxu1 %v219_v51  ;;  %2036 = vmatmul.mubr.f32.gmra.mrb[8].mxu0 %v237_v36  ;;  %v277_v2 = vand.u32 4294901760, %v2398_v56  ;;  %v2414_v10 = vsub.f32 %v76_v60, %v2406_v0  ;;  %v259_v20 = vand.u32 4294901760, %v258_v63 }
  0x1c   :  { %1951 = vmatprep.mubr.f32.mxu1 %v229_v52  ;;  %2038 = vmatprep.mubr.f32.mxu0 %v247_v45  ;;  %v287_v17 = vand.u32 4294901760, %v2411_v8  ;;  %v269_v30 = vand.u32 4294901760, %v268_v7 }
  0x1d   :  { %v278_v11 = vsub.f32 %v2398_v56, %v277_v2  ;;  %v297_v12 = vand.u32 4294901760, %v2414_v10 }
  0x1e   :  { %v288_v31 = vsub.f32 %v2411_v8, %v287_v17 }
  0x1f   :  { %1952 = vmatmul.mubr.f32.gmra.mrb[8].mxu1 %v239_v62  ;;  %2039 = vmatmul.mubr.f32.gmra.mrb[10].mxu0 %v257_v48  ;;  %v279_v32 = vand.u32 4294901760, %v278_v11  ;;  %v298_v33 = vsub.f32 %v2414_v10, %v297_v12 }
  0x20   :  { %1954 = vmatprep.mubr.f32.mxu1 %v249_v1  ;;  %2041 = vmatprep.mubr.f32.mxu0 %v267_v49  ;;  %v289_v35 = vand.u32 4294901760, %v288_v31 }
  0x21   :  { %v299_v36 = vand.u32 4294901760, %v298_v33 }
  0x23   :  { %1955 = vmatmul.mubr.f32.gmra.mrb[10].mxu1 %v259_v20  ;;  %2042 = vmatmul.mubr.f32.gmra.mrb[12].mxu0 %v277_v2 }
  0x24   :  { %1957 = vmatprep.mubr.f32.mxu1 %v269_v30  ;;  %2044 = vmatprep.mubr.f32.mxu0 %v287_v17 }
  0x27   :  { %1958 = vmatmul.mubr.f32.gmra.mrb[12].mxu1 %v279_v32  ;;  %2045 = vmatmul.mubr.f32.gmra.mrb[14].mxu0 %v297_v12 }
  0x28   :  { %1960 = vmatprep.mubr.f32.mxu1 %v289_v35  ;;  %2051 = vmatprep.mubr.f32.mxu0 %v2241_v9 }
  0x2b   :  { %1961 = vmatmul.mubr.f32.gmra.mrb[14].mxu1 %v299_v36  ;;  %2052 = vmatmul.mubr.f32.vlgmr.msra.gmra.mrb[0].mxu0 %v2251_v15 }
  0x2c   :  { %1967 = vmatprep.mubr.f32.mxu1 %v2241_v9  ;;  %2054 = vmatprep.mubr.f32.mxu0 %v2253_v16 }
  0x2d   :  { %2126 = vmatpush3.bf16.msra.mxu0 %v2249_v14 }
  0x2f   :  { %1968 = vmatmul.mubr.f32.vlgmr.msra.gmra.mrb[0].mxu1 %v2251_v15  ;;  %2055 = vmatmul.mubr.f32.gmra.mrb[2].mxu0 %v2265_v21 }
  0x30   :  { %2114 = vmatpush3.bf16.msra.mxu1 %v2111_v61  ;;  %1970 = vmatprep.mubr.f32.mxu1 %v2253_v16 }
  0x31   :  { %2057 = vmatprep.mubr.f32.mxu0 %v2277_v26 }
  0x33   :  { %1971 = vmatmul.mubr.f32.gmra.mrb[2].mxu1 %v2265_v21  ;;  %2058 = vmatmul.mubr.f32.gmra.mrb[4].mxu0 %v2303_v47 }
  0x34   :  { %1973 = vmatprep.mubr.f32.mxu1 %v2277_v26  ;;  %2060 = vmatprep.mubr.f32.mxu0 %v2319_v58 }
  0x37   :  { %1974 = vmatmul.mubr.f32.gmra.mrb[4].mxu1 %v2303_v47  ;;  %2061 = vmatmul.mubr.f32.gmra.mrb[6].mxu0 %v2338_v4 }
  0x38   :  { %1976 = vmatprep.mubr.f32.mxu1 %v2319_v58  ;;  %2063 = vmatprep.mubr.f32.mxu0 %v2340_v5 }
  0x3b   :  { %1977 = vmatmul.mubr.f32.gmra.mrb[6].mxu1 %v2338_v4  ;;  %2064 = vmatmul.mubr.f32.gmra.mrb[8].mxu0 %v2342_v6 }
  0x3c   :  { %1979 = vmatprep.mubr.f32.mxu1 %v2340_v5  ;;  %2066 = vmatprep.mubr.f32.mxu0 %v2358_v25 }
  0x3f   :  { %1980 = vmatmul.mubr.f32.gmra.mrb[8].mxu1 %v2342_v6  ;;  %2067 = vmatmul.mubr.f32.gmra.mrb[10].mxu0 %v2360_v27 }
  0x40   :  { %1982 = vmatprep.mubr.f32.mxu1 %v2358_v25  ;;  %2069 = vmatprep.mubr.f32.mxu0 %v2362_v28 }
  0x43   :  { %1983 = vmatmul.mubr.f32.gmra.mrb[10].mxu1 %v2360_v27  ;;  %2070 = vmatmul.mubr.f32.gmra.mrb[12].mxu0 %v2393_v53 }
  0x44   :  { %1985 = vmatprep.mubr.f32.mxu1 %v2362_v28  ;;  %2072 = vmatprep.mubr.f32.mxu0 %v2400_v59 }
  0x47   :  { %1986 = vmatmul.mubr.f32.gmra.mrb[12].mxu1 %v2393_v53  ;;  %2073 = vmatmul.mubr.f32.gmra.mrb[14].mxu0 %v2406_v0 }
  0x48   :  { %1988 = vmatprep.mubr.f32.mxu1 %v2400_v59  ;;  %2079 = vmatprep.mubr.f32.mxu0 %v2241_v9  ;;  %v1182_v9 = vlaneseq }
  0x4a   :  { %v1183_v14 = vshrl.u32 %v1182_v9, 7 }
  0x4b   :  { %1989 = vmatmul.mubr.f32.gmra.mrb[14].mxu1 %v2406_v0  ;;  %2080 = vmatmul.mubr.f32.vlgmr.msra.gmra.mrb[0].mxu0 %v2251_v15 }
  0x4c   :  { %1995 = vmatprep.mubr.f32.mxu1 %v2261_v19  ;;  %2082 = vmatprep.mubr.f32.mxu0 %v2253_v16  ;;  %v2486_v19 = vsub.s32 0, %v1183_v14 }
  0x4f   :  { %1996 = vmatmul.mubr.f32.vlgmr.msra.gmra.mrb[0].mxu1 %v2271_v23  ;;  %2083 = vmatmul.mubr.f32.gmra.mrb[2].mxu0 %v2265_v21  ;;  %v2488_v21 = vsub.s32 1, %v1183_v14  ;;  %v2490_v23 = vsub.s32 2, %v1183_v14 }
  0x50   :  { %1998 = vmatprep.mubr.f32.mxu1 %v2274_v24  ;;  %2085 = vmatprep.mubr.f32.mxu0 %v2277_v26  ;;  %v2492_v24 = vsub.s32 3, %v1183_v14 }
  0x53   :  { %1999 = vmatmul.mubr.f32.gmra.mrb[2].mxu1 %v2284_v29  ;;  %2086 = vmatmul.mubr.f32.gmra.mrb[4].mxu0 %v2303_v47  ;;  %v2494_v29 = vsub.s32 4, %v1183_v14  ;;  %v2498_v47 = vsub.s32 6, %v1183_v14 }
  0x54   :  { %2001 = vmatprep.mubr.f32.mxu1 %v2291_v34  ;;  %2088 = vmatprep.mubr.f32.mxu0 %v2319_v58  ;;  %v2496_v34 = vsub.s32 5, %v1183_v14 }
  0x57   :  { %2002 = vmatmul.mubr.f32.gmra.mrb[4].mxu1 %v2317_v57  ;;  %2089 = vmatmul.mubr.f32.gmra.mrb[6].mxu0 %v2338_v4  ;;  %v2500_v57 = vsub.s32 7, %v1183_v14 }
  0x58   :  { %2004 = vmatprep.mubr.f32.mxu1 %v2336_v3  ;;  %2091 = vmatprep.mubr.f32.mxu0 %v2340_v5 }
  0x5b   :  { %2005 = vmatmul.mubr.f32.gmra.mrb[6].mxu1 %v2350_v13  ;;  %2092 = vmatmul.mubr.f32.gmra.mrb[8].mxu0 %v2342_v6 }
  0x5c   :  { %2007 = vmatprep.mubr.f32.mxu1 %v2353_v18  ;;  %2094 = vmatprep.mubr.f32.mxu0 %v2358_v25 }
  0x5f   :  { %2008 = vmatmul.mubr.f32.gmra.mrb[8].mxu1 %v2356_v22  ;;  %2095 = vmatmul.mubr.f32.gmra.mrb[10].mxu0 %v2360_v27 }
  0x60   :  { %2010 = vmatprep.mubr.f32.mxu1 %v2372_v37  ;;  %2097 = vmatprep.mubr.f32.mxu0 %v2362_v28 }
  0x63   :  { %2011 = vmatmul.mubr.f32.gmra.mrb[10].mxu1 %v2375_v38  ;;  %2098 = vmatmul.mubr.f32.gmra.mrb[12].mxu0 %v2393_v53 }
  0x64   :  { %2013 = vmatprep.mubr.f32.mxu1 %v2378_v39  ;;  %2100 = vmatprep.mubr.f32.mxu0 %v2400_v59 }
  0x67   :  { %2014 = vmatmul.mubr.f32.gmra.mrb[12].mxu1 %v2398_v56  ;;  %2101 = vmatmul.mubr.f32.gmra.mrb[14].mxu0 %v2406_v0 }
  0x68   :  { %2016 = vmatprep.mubr.f32.mxu1 %v2411_v8 }
  0x6b   :  { %2017 = vmatmul.mubr.f32.gmra.mrb[14].mxu1 %v2414_v10 }
 0x11e   :  { %v2081_v15 = vpop.f32.mrb[0].mxu0 }
 0x11f   :  { %v1088_v16 = vpop.f32.mrb[1].mxu0 }
 0x122   :  { %v1997_v26 = vpop.f32.mrb[0].mxu1  ;;  %v2084_v58 = vpop.f32.mrb[2].mxu0 }
 0x123   :  { %v2127_v3 = vadd.f32 %v2081_v15, %v1997_v26  ;;  %v548_v4 = vpop.f32.mrb[1].mxu1  ;;  %v1100_v5 = vpop.f32.mrb[3].mxu0 }
 0x124   :  { %v2128_v6 = vadd.f32 %v1088_v16, %v548_v4 }
 0x125   :  { %v1226_v13 = vrot.slane %v2127_v3, %v2486_v19  ;;  %v1231_v18 = vrot.slane %v2127_v3, %v2488_v21  ;;  %v1236_v22 = vrot.slane %v2127_v3, %v2490_v23  ;;  %v1241_v25 = vrot.slane %v2127_v3, %v2492_v24 }
 0x126   :  { %v1246_v27 = vrot.slane %v2127_v3, %v2494_v29  ;;  %v1251_v28 = vrot.slane %v2127_v3, %v2496_v34  ;;  %v1256_v37 = vrot.slane %v2127_v3, %v2498_v47  ;;  %v1261_v38 = vrot.slane %v2127_v3, %v2500_v57  ;;  %v2000_v39 = vpop.f32.mrb[2].mxu1  ;;  %v2510_v40 = vpop.f32.mrb[4].mxu0 }
 0x127   :  { %1227 = vst.msk [vmem:[%s3215_s2 + $0x10] sm:$0x3] %vm1186_vm1, %v1226_v13  ;;  %1232 = vst.msk [vmem:[%s3215_s2 + $0x12] sm:$0x3] %vm1186_vm1, %v1231_v18  ;;  %v1185_v41 = vrot.slane %v2128_v6, %v2486_v19  ;;  %v1191_v42 = vrot.slane %v2128_v6, %v2488_v21  ;;  %v1196_v43 = vrot.slane %v2128_v6, %v2490_v23  ;;  %v562_v45 = vpop.f32.mrb[3].mxu1  ;;  %v1112_v46 = vpop.f32.mrb[5].mxu0 }
 0x128   :  { %1237 = vst.msk [vmem:[%s3215_s2 + $0x14] sm:$0x3] %vm1186_vm1, %v1236_v22  ;;  %1242 = vst.msk [vmem:[%s3215_s2 + $0x16] sm:$0x3] %vm1186_vm1, %v1241_v25  ;;  %v1201_v44 = vrot.slane %v2128_v6, %v2492_v24  ;;  %v1206_v48 = vrot.slane %v2128_v6, %v2494_v29  ;;  %v1211_v49 = vrot.slane %v2128_v6, %v2496_v34 }
 0x129   :  { %1247 = vst.msk [vmem:[%s3215_s2 + $0x18] sm:$0x3] %vm1186_vm1, %v1246_v27  ;;  %1252 = vst.msk [vmem:[%s3215_s2 + $0x1a] sm:$0x3] %vm1186_vm1, %v1251_v28  ;;  %v1216_v50 = vrot.slane %v2128_v6, %v2498_v47  ;;  %v1221_v51 = vrot.slane %v2128_v6, %v2500_v57  ;;  %v2129_v52 = vadd.f32 %v2084_v58, %v2000_v39 }
 0x12a   :  { %1257 = vst.msk [vmem:[%s3215_s2 + $0x1c] sm:$0x3] %vm1186_vm1, %v1256_v37  ;;  %1262 = vst.msk [vmem:[%s3215_s2 + $0x1e] sm:$0x3] %vm1186_vm1, %v1261_v38  ;;  %v2130_v53 = vadd.f32 %v1100_v5, %v562_v45  ;;  %v2003_v54 = vpop.f32.mrb[4].mxu1  ;;  %v2090_v55 = vpop.f32.mrb[6].mxu0 }
 0x12b   :  { %1187 = vst.msk [vmem:[%s3215_s2] sm:$0x3] %vm1186_vm1, %v1185_v41  ;;  %1192 = vst.msk [vmem:[%s3215_s2 + $0x2] sm:$0x3] %vm1186_vm1, %v1191_v42  ;;  %v1306_v56 = vrot.slane %v2129_v52, %v2486_v19  ;;  %v1311_v59 = vrot.slane %v2129_v52, %v2488_v21  ;;  %v1316_v60 = vrot.slane %v2129_v52, %v2490_v23  ;;  %v576_v62 = vpop.f32.mrb[5].mxu1  ;;  %v1124_v63 = vpop.f32.mrb[7].mxu0 }
 0x12c   :  { %1197 = vst.msk [vmem:[%s3215_s2 + $0x4] sm:$0x3] %vm1186_vm1, %v1196_v43  ;;  %1202 = vst.msk [vmem:[%s3215_s2 + $0x6] sm:$0x3] %vm1186_vm1, %v1201_v44  ;;  %v1321_v61 = vrot.slane %v2129_v52, %v2492_v24  ;;  %v1326_v0 = vrot.slane %v2129_v52, %v2494_v29  ;;  %v1331_v1 = vrot.slane %v2129_v52, %v2496_v34 }
 0x12d   :  { %1207 = vst.msk [vmem:[%s3215_s2 + $0x8] sm:$0x3] %vm1186_vm1, %v1206_v48  ;;  %1212 = vst.msk [vmem:[%s3215_s2 + $0xa] sm:$0x3] %vm1186_vm1, %v1211_v49  ;;  %v1336_v2 = vrot.slane %v2129_v52, %v2498_v47  ;;  %v1341_v7 = vrot.slane %v2129_v52, %v2500_v57  ;;  %v1266_v8 = vrot.slane %v2130_v53, %v2486_v19 }
 0x12e   :  { %1217 = vst.msk [vmem:[%s3215_s2 + $0xc] sm:$0x3] %vm1186_vm1, %v1216_v50  ;;  %1222 = vst.msk [vmem:[%s3215_s2 + $0xe] sm:$0x3] %vm1186_vm1, %v1221_v51  ;;  %v1271_v10 = vrot.slane %v2130_v53, %v2488_v21  ;;  %v1276_v17 = vrot.slane %v2130_v53, %v2490_v23  ;;  %v1281_v20 = vrot.slane %v2130_v53, %v2492_v24  ;;  %v2006_v32 = vpop.f32.mrb[6].mxu1  ;;  %v2632_v33 = vpop.f32.mrb[8].mxu0 }
 0x12f   :  { %1307 = vst.msk [vmem:[%s3215_s2 + $0x30] sm:$0x3] %vm1186_vm1, %v1306_v56  ;;  %1312 = vst.msk [vmem:[%s3215_s2 + $0x32] sm:$0x3] %vm1186_vm1, %v1311_v59  ;;  %v1286_v11 = vrot.slane %v2130_v53, %v2494_v29  ;;  %v1291_v12 = vrot.slane %v2130_v53, %v2496_v34  ;;  %v1296_v30 = vrot.slane %v2130_v53, %v2498_v47  ;;  %v590_v14 = vpop.f32.mrb[7].mxu1  ;;  %v2653_v15 = vpop.f32.mrb[9].mxu0 }
 0x130   :  { %1317 = vst.msk [vmem:[%s3215_s2 + $0x34] sm:$0x3] %vm1186_vm1, %v1316_v60  ;;  %1322 = vst.msk [vmem:[%s3215_s2 + $0x36] sm:$0x3] %vm1186_vm1, %v1321_v61  ;;  %v1301_v31 = vrot.slane %v2130_v53, %v2500_v57  ;;  %v2131_v35 = vadd.f32 %v2510_v40, %v2003_v54  ;;  %v2132_v36 = vadd.f32 %v1112_v46, %v576_v62 }
 0x131   :  { %1327 = vst.msk [vmem:[%s3215_s2 + $0x38] sm:$0x3] %vm1186_vm1, %v1326_v0  ;;  %1332 = vst.msk [vmem:[%s3215_s2 + $0x3a] sm:$0x3] %vm1186_vm1, %v1331_v1  ;;  %v2651_v9 = vadd.f32 %v2090_v55, %v2006_v32  ;;  %v2671_v16 = vadd.f32 %v1124_v63, %v590_v14 }
 0x132   :  { %1337 = vst.msk [vmem:[%s3215_s2 + $0x3c] sm:$0x3] %vm1186_vm1, %v1336_v2  ;;  %1342 = vst.msk [vmem:[%s3215_s2 + $0x3e] sm:$0x3] %vm1186_vm1, %v1341_v7  ;;  %v1386_v26 = vrot.slane %v2131_v35, %v2486_v19  ;;  %v1391_v58 = vrot.slane %v2131_v35, %v2488_v21  ;;  %v1396_v3 = vrot.slane %v2131_v35, %v2490_v23  ;;  %v2009_v22 = vpop.f32.mrb[8].mxu1  ;;  %v2096_v25 = vpop.f32.mrb[10].mxu0 }
 0x133   :  { %1267 = vst.msk [vmem:[%s3215_s2 + $0x20] sm:$0x3] %vm1186_vm1, %v1266_v8  ;;  %1272 = vst.msk [vmem:[%s3215_s2 + $0x22] sm:$0x3] %vm1186_vm1, %v1271_v10  ;;  %v1401_v4 = vrot.slane %v2131_v35, %v2492_v24  ;;  %v1406_v5 = vrot.slane %v2131_v35, %v2494_v29  ;;  %v1411_v6 = vrot.slane %v2131_v35, %v2496_v34  ;;  %v604_v39 = vpop.f32.mrb[9].mxu1  ;;  %v1148_v40 = vpop.f32.mrb[11].mxu0 }
 0x134   :  { %1277 = vst.msk [vmem:[%s3215_s2 + $0x24] sm:$0x3] %vm1186_vm1, %v1276_v17  ;;  %1282 = vst.msk [vmem:[%s3215_s2 + $0x26] sm:$0x3] %vm1186_vm1, %v1281_v20  ;;  %v1416_v13 = vrot.slane %v2131_v35, %v2498_v47  ;;  %v1421_v18 = vrot.slane %v2131_v35, %v2500_v57  ;;  %v1346_v27 = vrot.slane %v2132_v36, %v2486_v19 }
 0x135   :  { %1287 = vst.msk [vmem:[%s3215_s2 + $0x28] sm:$0x3] %vm1186_vm1, %v1286_v11  ;;  %1292 = vst.msk [vmem:[%s3215_s2 + $0x2a] sm:$0x3] %vm1186_vm1, %v1291_v12  ;;  %v1351_v28 = vrot.slane %v2132_v36, %v2488_v21  ;;  %v1356_v37 = vrot.slane %v2132_v36, %v2490_v23  ;;  %v1361_v38 = vrot.slane %v2132_v36, %v2492_v24 }
 0x136   :  { %1297 = vst.msk [vmem:[%s3215_s2 + $0x2c] sm:$0x3] %vm1186_vm1, %v1296_v30  ;;  %1302 = vst.msk [vmem:[%s3215_s2 + $0x2e] sm:$0x3] %vm1186_vm1, %v1301_v31  ;;  %v1366_v41 = vrot.slane %v2132_v36, %v2494_v29  ;;  %v1371_v42 = vrot.slane %v2132_v36, %v2496_v34  ;;  %v1376_v43 = vrot.slane %v2132_v36, %v2498_v47  ;;  %v2012_v54 = vpop.f32.mrb[10].mxu1  ;;  %v2769_v55 = vpop.f32.mrb[12].mxu0 }
 0x137   :  { %1387 = vst.msk [vmem:[%s3215_s2 + $0x50] sm:$0x3] %vm1186_vm1, %v1386_v26  ;;  %1392 = vst.msk [vmem:[%s3215_s2 + $0x52] sm:$0x3] %vm1186_vm1, %v1391_v58  ;;  %v1381_v44 = vrot.slane %v2132_v36, %v2500_v57  ;;  %v1466_v45 = vrot.slane %v2651_v9, %v2486_v19  ;;  %v1471_v46 = vrot.slane %v2651_v9, %v2488_v21  ;;  %v618_v62 = vpop.f32.mrb[11].mxu1  ;;  %v2795_v63 = vpop.f32.mrb[13].mxu0 }
 0x138   :  { %1397 = vst.msk [vmem:[%s3215_s2 + $0x54] sm:$0x3] %vm1186_vm1, %v1396_v3  ;;  %1402 = vst.msk [vmem:[%s3215_s2 + $0x56] sm:$0x3] %vm1186_vm1, %v1401_v4  ;;  %v1476_v48 = vrot.slane %v2651_v9, %v2490_v23  ;;  %v1481_v49 = vrot.slane %v2651_v9, %v2492_v24  ;;  %v1486_v50 = vrot.slane %v2651_v9, %v2494_v29 }
 0x139   :  { %1407 = vst.msk [vmem:[%s3215_s2 + $0x58] sm:$0x3] %vm1186_vm1, %v1406_v5  ;;  %1412 = vst.msk [vmem:[%s3215_s2 + $0x5a] sm:$0x3] %vm1186_vm1, %v1411_v6  ;;  %v1491_v51 = vrot.slane %v2651_v9, %v2496_v34  ;;  %v1496_v52 = vrot.slane %v2651_v9, %v2498_v47  ;;  %v1501_v53 = vrot.slane %v2651_v9, %v2500_v57 }
 0x13a   :  { %1417 = vst.msk [vmem:[%s3215_s2 + $0x5c] sm:$0x3] %vm1186_vm1, %v1416_v13  ;;  %1422 = vst.msk [vmem:[%s3215_s2 + $0x5e] sm:$0x3] %vm1186_vm1, %v1421_v18  ;;  %v1426_v56 = vrot.slane %v2671_v16, %v2486_v19  ;;  %v1431_v59 = vrot.slane %v2671_v16, %v2488_v21  ;;  %v1436_v60 = vrot.slane %v2671_v16, %v2490_v23  ;;  %v2859_v11 = vpop.f32.mrb[12].mxu1  ;;  %v2861_v12 = vpop.f32.mrb[14].mxu0 }
 0x13b   :  { %1347 = vst.msk [vmem:[%s3215_s2 + $0x40] sm:$0x3] %vm1186_vm1, %v1346_v27  ;;  %1352 = vst.msk [vmem:[%s3215_s2 + $0x42] sm:$0x3] %vm1186_vm1, %v1351_v28  ;;  %v1441_v61 = vrot.slane %v2671_v16, %v2492_v24  ;;  %v1446_v0 = vrot.slane %v2671_v16, %v2494_v29  ;;  %v1451_v1 = vrot.slane %v2671_v16, %v2496_v34  ;;  %v632_v35 = vpop.f32.mrb[13].mxu1  ;;  %v1172_v36 = vpop.f32.mrb[15].mxu0 }
 0x13c   :  { %1357 = vst.msk [vmem:[%s3215_s2 + $0x44] sm:$0x3] %vm1186_vm1, %v1356_v37  ;;  %1362 = vst.msk [vmem:[%s3215_s2 + $0x46] sm:$0x3] %vm1186_vm1, %v1361_v38  ;;  %v1456_v2 = vrot.slane %v2671_v16, %v2498_v47  ;;  %v1461_v7 = vrot.slane %v2671_v16, %v2500_v57  ;;  %v2135_v8 = vadd.f32 %v2632_v33, %v2009_v22 }
 0x13d   :  { %1367 = vst.msk [vmem:[%s3215_s2 + $0x48] sm:$0x3] %vm1186_vm1, %v1366_v41  ;;  %1372 = vst.msk [vmem:[%s3215_s2 + $0x4a] sm:$0x3] %vm1186_vm1, %v1371_v42  ;;  %v2136_v10 = vadd.f32 %v2653_v15, %v604_v39  ;;  %v2839_v17 = vadd.f32 %v2096_v25, %v2012_v54  ;;  %v2841_v20 = vadd.f32 %v1148_v40, %v618_v62 }
 0x13e   :  { %1377 = vst.msk [vmem:[%s3215_s2 + $0x4c] sm:$0x3] %vm1186_vm1, %v1376_v43  ;;  %1382 = vst.msk [vmem:[%s3215_s2 + $0x4e] sm:$0x3] %vm1186_vm1, %v1381_v44  ;;  %v1546_v30 = vrot.slane %v2135_v8, %v2486_v19  ;;  %v1551_v31 = vrot.slane %v2135_v8, %v2488_v21  ;;  %v1556_v32 = vrot.slane %v2135_v8, %v2490_v23  ;;  %v2018_v22 = vpop.f32.mrb[14].mxu1 }
 0x13f   :  { %1467 = vst.msk [vmem:[%s3215_s2 + $0x70] sm:$0x3] %vm1186_vm1, %v1466_v45  ;;  %1472 = vst.msk [vmem:[%s3215_s2 + $0x72] sm:$0x3] %vm1186_vm1, %v1471_v46  ;;  %v1561_v33 = vrot.slane %v2135_v8, %v2492_v24  ;;  %v1566_v9 = vrot.slane %v2135_v8, %v2494_v29  ;;  %v1571_v14 = vrot.slane %v2135_v8, %v2496_v34  ;;  %v646_v38 = vpop.f32.mrb[15].mxu1 }
 0x140   :  { %1477 = vst.msk [vmem:[%s3215_s2 + $0x74] sm:$0x3] %vm1186_vm1, %v1476_v48  ;;  %1482 = vst.msk [vmem:[%s3215_s2 + $0x76] sm:$0x3] %vm1186_vm1, %v1481_v49  ;;  %v1576_v15 = vrot.slane %v2135_v8, %v2498_v47  ;;  %v1581_v16 = vrot.slane %v2135_v8, %v2500_v57  ;;  %v1506_v26 = vrot.slane %v2136_v10, %v2486_v19 }
 0x141   :  { %1487 = vst.msk [vmem:[%s3215_s2 + $0x78] sm:$0x3] %vm1186_vm1, %v1486_v50  ;;  %1492 = vst.msk [vmem:[%s3215_s2 + $0x7a] sm:$0x3] %vm1186_vm1, %v1491_v51  ;;  %v1511_v58 = vrot.slane %v2136_v10, %v2488_v21  ;;  %v1516_v3 = vrot.slane %v2136_v10, %v2490_v23  ;;  %v1521_v4 = vrot.slane %v2136_v10, %v2492_v24 }
 0x142   :  { %1497 = vst.msk [vmem:[%s3215_s2 + $0x7c] sm:$0x3] %vm1186_vm1, %v1496_v52  ;;  %1502 = vst.msk [vmem:[%s3215_s2 + $0x7e] sm:$0x3] %vm1186_vm1, %v1501_v53  ;;  %v1526_v5 = vrot.slane %v2136_v10, %v2494_v29  ;;  %v1531_v6 = vrot.slane %v2136_v10, %v2496_v34  ;;  %v1536_v13 = vrot.slane %v2136_v10, %v2498_v47 }
 0x143   :  { %1427 = vst.msk [vmem:[%s3215_s2 + $0x60] sm:$0x3] %vm1186_vm1, %v1426_v56  ;;  %1432 = vst.msk [vmem:[%s3215_s2 + $0x62] sm:$0x3] %vm1186_vm1, %v1431_v59  ;;  %v1541_v18 = vrot.slane %v2136_v10, %v2500_v57  ;;  %v1626_v25 = vrot.slane %v2839_v17, %v2486_v19  ;;  %v1631_v27 = vrot.slane %v2839_v17, %v2488_v21 }
 0x144   :  { %1437 = vst.msk [vmem:[%s3215_s2 + $0x64] sm:$0x3] %vm1186_vm1, %v1436_v60  ;;  %1442 = vst.msk [vmem:[%s3215_s2 + $0x66] sm:$0x3] %vm1186_vm1, %v1441_v61  ;;  %v1636_v28 = vrot.slane %v2839_v17, %v2490_v23  ;;  %v1641_v37 = vrot.slane %v2839_v17, %v2492_v24  ;;  %v1646_v39 = vrot.slane %v2839_v17, %v2494_v29 }
 0x145   :  { %1447 = vst.msk [vmem:[%s3215_s2 + $0x68] sm:$0x3] %vm1186_vm1, %v1446_v0  ;;  %1452 = vst.msk [vmem:[%s3215_s2 + $0x6a] sm:$0x3] %vm1186_vm1, %v1451_v1  ;;  %v1651_v40 = vrot.slane %v2839_v17, %v2496_v34  ;;  %v1656_v41 = vrot.slane %v2839_v17, %v2498_v47  ;;  %v1661_v42 = vrot.slane %v2839_v17, %v2500_v57 }
 0x146   :  { %1457 = vst.msk [vmem:[%s3215_s2 + $0x6c] sm:$0x3] %vm1186_vm1, %v1456_v2  ;;  %1462 = vst.msk [vmem:[%s3215_s2 + $0x6e] sm:$0x3] %vm1186_vm1, %v1461_v7  ;;  %v1586_v43 = vrot.slane %v2841_v20, %v2486_v19  ;;  %v1591_v44 = vrot.slane %v2841_v20, %v2488_v21  ;;  %v1596_v45 = vrot.slane %v2841_v20, %v2490_v23 }
 0x147   :  { %1547 = vst.msk [vmem:[%s3215_s2 + $0x90] sm:$0x3] %vm1186_vm1, %v1546_v30  ;;  %1552 = vst.msk [vmem:[%s3215_s2 + $0x92] sm:$0x3] %vm1186_vm1, %v1551_v31  ;;  %v1601_v46 = vrot.slane %v2841_v20, %v2492_v24  ;;  %v1606_v48 = vrot.slane %v2841_v20, %v2494_v29  ;;  %v1611_v49 = vrot.slane %v2841_v20, %v2496_v34 }
 0x148   :  { %1557 = vst.msk [vmem:[%s3215_s2 + $0x94] sm:$0x3] %vm1186_vm1, %v1556_v32  ;;  %1562 = vst.msk [vmem:[%s3215_s2 + $0x96] sm:$0x3] %vm1186_vm1, %v1561_v33  ;;  %v1616_v50 = vrot.slane %v2841_v20, %v2498_v47  ;;  %v1621_v51 = vrot.slane %v2841_v20, %v2500_v57  ;;  %v2139_v52 = vadd.f32 %v2769_v55, %v2859_v11 }
 0x149   :  { %1567 = vst.msk [vmem:[%s3215_s2 + $0x98] sm:$0x3] %vm1186_vm1, %v1566_v9  ;;  %1572 = vst.msk [vmem:[%s3215_s2 + $0x9a] sm:$0x3] %vm1186_vm1, %v1571_v14  ;;  %v2140_v53 = vadd.f32 %v2795_v63, %v632_v35  ;;  %v2141_v54 = vadd.f32 %v2861_v12, %v2018_v22  ;;  %v3027_v56 = vadd.f32 %v1172_v36, %v646_v38 }
 0x14a   :  { %1577 = vst.msk [vmem:[%s3215_s2 + $0x9c] sm:$0x3] %vm1186_vm1, %v1576_v15  ;;  %1582 = vst.msk [vmem:[%s3215_s2 + $0x9e] sm:$0x3] %vm1186_vm1, %v1581_v16  ;;  %v1706_v55 = vrot.slane %v2139_v52, %v2486_v19  ;;  %v1711_v59 = vrot.slane %v2139_v52, %v2488_v21  ;;  %v1716_v60 = vrot.slane %v2139_v52, %v2490_v23 }
 0x14b   :  { %1507 = vst.msk [vmem:[%s3215_s2 + $0x80] sm:$0x3] %vm1186_vm1, %v1506_v26  ;;  %1512 = vst.msk [vmem:[%s3215_s2 + $0x82] sm:$0x3] %vm1186_vm1, %v1511_v58  ;;  %v1721_v61 = vrot.slane %v2139_v52, %v2492_v24  ;;  %v1726_v62 = vrot.slane %v2139_v52, %v2494_v29  ;;  %v1731_v63 = vrot.slane %v2139_v52, %v2496_v34 }
 0x14c   :  { %1517 = vst.msk [vmem:[%s3215_s2 + $0x84] sm:$0x3] %vm1186_vm1, %v1516_v3  ;;  %1522 = vst.msk [vmem:[%s3215_s2 + $0x86] sm:$0x3] %vm1186_vm1, %v1521_v4  ;;  %v1736_v0 = vrot.slane %v2139_v52, %v2498_v47  ;;  %v1741_v1 = vrot.slane %v2139_v52, %v2500_v57  ;;  %v1666_v2 = vrot.slane %v2140_v53, %v2486_v19 }
 0x14d   :  { %1527 = vst.msk [vmem:[%s3215_s2 + $0x88] sm:$0x3] %vm1186_vm1, %v1526_v5  ;;  %1532 = vst.msk [vmem:[%s3215_s2 + $0x8a] sm:$0x3] %vm1186_vm1, %v1531_v6  ;;  %v1671_v7 = vrot.slane %v2140_v53, %v2488_v21  ;;  %v1676_v8 = vrot.slane %v2140_v53, %v2490_v23  ;;  %v1681_v10 = vrot.slane %v2140_v53, %v2492_v24 }
 0x14e   :  { %1537 = vst.msk [vmem:[%s3215_s2 + $0x8c] sm:$0x3] %vm1186_vm1, %v1536_v13  ;;  %1542 = vst.msk [vmem:[%s3215_s2 + $0x8e] sm:$0x3] %vm1186_vm1, %v1541_v18  ;;  %v1686_v17 = vrot.slane %v2140_v53, %v2494_v29  ;;  %v1691_v20 = vrot.slane %v2140_v53, %v2496_v34  ;;  %v1696_v11 = vrot.slane %v2140_v53, %v2498_v47 }
 0x14f   :  { %1627 = vst.msk [vmem:[%s3215_s2 + $0xb0] sm:$0x3] %vm1186_vm1, %v1626_v25  ;;  %1632 = vst.msk [vmem:[%s3215_s2 + $0xb2] sm:$0x3] %vm1186_vm1, %v1631_v27  ;;  %v1701_v12 = vrot.slane %v2140_v53, %v2500_v57  ;;  %v1786_v30 = vrot.slane %v2141_v54, %v2486_v19  ;;  %v1791_v31 = vrot.slane %v2141_v54, %v2488_v21 }
 0x150   :  { %1637 = vst.msk [vmem:[%s3215_s2 + $0xb4] sm:$0x3] %vm1186_vm1, %v1636_v28  ;;  %1642 = vst.msk [vmem:[%s3215_s2 + $0xb6] sm:$0x3] %vm1186_vm1, %v1641_v37  ;;  %v1796_v32 = vrot.slane %v2141_v54, %v2490_v23  ;;  %v1801_v33 = vrot.slane %v2141_v54, %v2492_v24  ;;  %v1806_v35 = vrot.slane %v2141_v54, %v2494_v29 }
 0x151   :  { %1647 = vst.msk [vmem:[%s3215_s2 + $0xb8] sm:$0x3] %vm1186_vm1, %v1646_v39  ;;  %1652 = vst.msk [vmem:[%s3215_s2 + $0xba] sm:$0x3] %vm1186_vm1, %v1651_v40  ;;  %v1811_v36 = vrot.slane %v2141_v54, %v2496_v34  ;;  %v1816_v9 = vrot.slane %v2141_v54, %v2498_v47  ;;  %v1821_v14 = vrot.slane %v2141_v54, %v2500_v57 }
 0x152   :  { %1657 = vst.msk [vmem:[%s3215_s2 + $0xbc] sm:$0x3] %vm1186_vm1, %v1656_v41  ;;  %1662 = vst.msk [vmem:[%s3215_s2 + $0xbe] sm:$0x3] %vm1186_vm1, %v1661_v42  ;;  %v1746_v15 = vrot.slane %v3027_v56, %v2486_v19  ;;  %v1751_v16 = vrot.slane %v3027_v56, %v2488_v21  ;;  %v1756_v26 = vrot.slane %v3027_v56, %v2490_v23 }
 0x153   :  { %1587 = vst.msk [vmem:[%s3215_s2 + $0xa0] sm:$0x3] %vm1186_vm1, %v1586_v43  ;;  %1592 = vst.msk [vmem:[%s3215_s2 + $0xa2] sm:$0x3] %vm1186_vm1, %v1591_v44  ;;  %v1761_v58 = vrot.slane %v3027_v56, %v2492_v24  ;;  %v1766_v19 = vrot.slane %v3027_v56, %v2494_v29  ;;  %v1771_v21 = vrot.slane %v3027_v56, %v2496_v34 }
 0x154   :  { %1597 = vst.msk [vmem:[%s3215_s2 + $0xa4] sm:$0x3] %vm1186_vm1, %v1596_v45  ;;  %1602 = vst.msk [vmem:[%s3215_s2 + $0xa6] sm:$0x3] %vm1186_vm1, %v1601_v46  ;;  %v1776_v23 = vrot.slane %v3027_v56, %v2498_v47  ;;  %v1781_v24 = vrot.slane %v3027_v56, %v2500_v57 }
 0x155   :  { %1607 = vst.msk [vmem:[%s3215_s2 + $0xa8] sm:$0x3] %vm1186_vm1, %v1606_v48  ;;  %1612 = vst.msk [vmem:[%s3215_s2 + $0xaa] sm:$0x3] %vm1186_vm1, %v1611_v49 }
 0x156   :  { %1617 = vst.msk [vmem:[%s3215_s2 + $0xac] sm:$0x3] %vm1186_vm1, %v1616_v50  ;;  %1622 = vst.msk [vmem:[%s3215_s2 + $0xae] sm:$0x3] %vm1186_vm1, %v1621_v51 }
 0x157   :  { %1707 = vst.msk [vmem:[%s3215_s2 + $0xd0] sm:$0x3] %vm1186_vm1, %v1706_v55  ;;  %1712 = vst.msk [vmem:[%s3215_s2 + $0xd2] sm:$0x3] %vm1186_vm1, %v1711_v59 }
 0x158   :  { %1717 = vst.msk [vmem:[%s3215_s2 + $0xd4] sm:$0x3] %vm1186_vm1, %v1716_v60  ;;  %1722 = vst.msk [vmem:[%s3215_s2 + $0xd6] sm:$0x3] %vm1186_vm1, %v1721_v61 }
 0x159   :  { %1727 = vst.msk [vmem:[%s3215_s2 + $0xd8] sm:$0x3] %vm1186_vm1, %v1726_v62  ;;  %1732 = vst.msk [vmem:[%s3215_s2 + $0xda] sm:$0x3] %vm1186_vm1, %v1731_v63 }
 0x15a   :  { %1737 = vst.msk [vmem:[%s3215_s2 + $0xdc] sm:$0x3] %vm1186_vm1, %v1736_v0  ;;  %1742 = vst.msk [vmem:[%s3215_s2 + $0xde] sm:$0x3] %vm1186_vm1, %v1741_v1 }
 0x15b   :  { %1667 = vst.msk [vmem:[%s3215_s2 + $0xc0] sm:$0x3] %vm1186_vm1, %v1666_v2  ;;  %1672 = vst.msk [vmem:[%s3215_s2 + $0xc2] sm:$0x3] %vm1186_vm1, %v1671_v7 }
 0x15c   :  { %1677 = vst.msk [vmem:[%s3215_s2 + $0xc4] sm:$0x3] %vm1186_vm1, %v1676_v8  ;;  %1682 = vst.msk [vmem:[%s3215_s2 + $0xc6] sm:$0x3] %vm1186_vm1, %v1681_v10 }
 0x15d   :  { %1687 = vst.msk [vmem:[%s3215_s2 + $0xc8] sm:$0x3] %vm1186_vm1, %v1686_v17  ;;  %1692 = vst.msk [vmem:[%s3215_s2 + $0xca] sm:$0x3] %vm1186_vm1, %v1691_v20 }
 0x15e   :  { %1697 = vst.msk [vmem:[%s3215_s2 + $0xcc] sm:$0x3] %vm1186_vm1, %v1696_v11  ;;  %1702 = vst.msk [vmem:[%s3215_s2 + $0xce] sm:$0x3] %vm1186_vm1, %v1701_v12 }
 0x15f   :  { %1787 = vst.msk [vmem:[%s3215_s2 + $0xf0] sm:$0x3] %vm1186_vm1, %v1786_v30  ;;  %1792 = vst.msk [vmem:[%s3215_s2 + $0xf2] sm:$0x3] %vm1186_vm1, %v1791_v31 }
 0x160   :  { %1797 = vst.msk [vmem:[%s3215_s2 + $0xf4] sm:$0x3] %vm1186_vm1, %v1796_v32  ;;  %1802 = vst.msk [vmem:[%s3215_s2 + $0xf6] sm:$0x3] %vm1186_vm1, %v1801_v33 }
 0x161   :  { %1807 = vst.msk [vmem:[%s3215_s2 + $0xf8] sm:$0x3] %vm1186_vm1, %v1806_v35  ;;  %1812 = vst.msk [vmem:[%s3215_s2 + $0xfa] sm:$0x3] %vm1186_vm1, %v1811_v36 }
 0x162   :  { %1817 = vst.msk [vmem:[%s3215_s2 + $0xfc] sm:$0x3] %vm1186_vm1, %v1816_v9  ;;  %1822 = vst.msk [vmem:[%s3215_s2 + $0xfe] sm:$0x3] %vm1186_vm1, %v1821_v14 }
 0x163   :  { %1747 = vst.msk [vmem:[%s3215_s2 + $0xe0] sm:$0x3] %vm1186_vm1, %v1746_v15  ;;  %1752 = vst.msk [vmem:[%s3215_s2 + $0xe2] sm:$0x3] %vm1186_vm1, %v1751_v16 }
 0x164   :  { %1757 = vst.msk [vmem:[%s3215_s2 + $0xe4] sm:$0x3] %vm1186_vm1, %v1756_v26  ;;  %1762 = vst.msk [vmem:[%s3215_s2 + $0xe6] sm:$0x3] %vm1186_vm1, %v1761_v58 }
 0x165   :  { %1767 = vst.msk [vmem:[%s3215_s2 + $0xe8] sm:$0x3] %vm1186_vm1, %v1766_v19  ;;  %1772 = vst.msk [vmem:[%s3215_s2 + $0xea] sm:$0x3] %vm1186_vm1, %v1771_v21 }
 0x166   :  { %1777 = vst.msk [vmem:[%s3215_s2 + $0xec] sm:$0x3] %vm1186_vm1, %v1776_v23  ;;  %1782 = vst.msk [vmem:[%s3215_s2 + $0xee] sm:$0x3] %vm1186_vm1, %v1781_v24 }

</bundles_post_ra>
